<compile_context>
chip_gen: v5e
topology: v5e:2x2
jax: 0.10.0
libtpu: 0.0.40
codegen_flags: <defaults>
</compile_context>

<pallas_src>
import functools

import jax
import jax.numpy as jnp
from jax.experimental import pallas as pl
from jax.experimental.pallas import tpu as pltpu

_LANE = 128


def _round_up(n, m):
    return ((n + m - 1) // m) * m


def _snn_kernel(x_ref,
                w1, b1, w2, b2, w3, b3, w4, b4, w5, b5,
                out_ref,
                *, beta, threshold, T, B):
    # --- Layer 1 hoisted out of the serial time loop: the input layer has no
    # dependence on spikes/membranes, so do one big MXU call over all timesteps.
    W1 = w1[...]
    cur1_all = (jnp.dot(x_ref[...], W1, preferred_element_type=jnp.float32)
                + b1[...])                                        # (T*B, Hpad)

    # Loop-invariant weights; biases pre-broadcast once (JAX does not CSE
    # broadcast_in_dim inside the unrolled loop).
    Ws = (w2[...], w3[...], w4[...], w5[...])
    Bs = tuple(jnp.broadcast_to(b[...], (B, w.shape[1]))
               for b, w in zip((b2, b3, b4, b5), Ws))

    def leaky(cur, m_prev):
        # reset-by-subtraction fused into a single select.
        m_new = beta * m_prev + cur - jnp.where(m_prev > threshold, threshold, 0.0)
        spk = jnp.where(m_new > threshold, 1.0, 0.0)
        return spk, m_new

    # utils.reset(self.net): membranes start at zero; plain loop-carried values.
    mems = [jnp.zeros((B, W1.shape[1]), jnp.float32)]
    mems += [jnp.zeros((B, w.shape[1]), jnp.float32) for w in Ws]

    # T is tiny and static -> fully unrolled serial time loop.
    for t in range(T):
        s, mems[0] = leaky(cur1_all[t * B:(t + 1) * B, :], mems[0])
        for li in range(4):
            cur = jnp.dot(s, Ws[li], preferred_element_type=jnp.float32) + Bs[li]
            s, mems[li + 1] = leaky(cur, mems[li + 1])
        # Lane-dense (B, 128) unmasked store into the single VMEM output slab.
        out_ref[t * B:(t + 1) * B, :] = s.astype(out_ref.dtype)


def dynamic_snn_forward(data, params, *, beta, threshold):
    """data: [T, B, I] float32; params: list of (W [in,out], b [1,out]) for 5 layers."""
    T, B, I = data.shape
    O = params[-1][0].shape[1]

    # Zero-pad every feature dimension up to the 128-wide TPU lane so all loads,
    # stores and MXU tiles are unmasked. Padded lanes carry exact zeros through
    # the whole network (zero weight rows/cols, zero bias) and are sliced off at
    # the end, so the math is unchanged.
    padded = []
    for w, b in params:
        fi, fo = w.shape
        fip, fop = _round_up(fi, _LANE), _round_up(fo, _LANE)
        wp = jnp.zeros((fip, fop), jnp.float32).at[:fi, :fo].set(w)
        bp = jnp.zeros((1, fop), jnp.float32).at[:, :fo].set(b)
        padded.extend([wp, bp])

    IP = _round_up(I, _LANE)
    OP = _round_up(O, _LANE)
    xp = jnp.zeros((T * B, IP), jnp.float32).at[:, :I].set(data.reshape(T * B, I))

    kernel = functools.partial(_snn_kernel, beta=float(beta),
                               threshold=float(threshold), T=T, B=B)

    n_in = 1 + len(padded)
    out = pl.pallas_call(
        kernel,
        out_shape=jax.ShapeDtypeStruct((T * B, OP), jnp.float32),
        in_specs=[pl.BlockSpec(memory_space=pltpu.MemorySpace.VMEM)
                  for _ in range(n_in)],
        out_specs=pl.BlockSpec(memory_space=pltpu.MemorySpace.VMEM),
    )(xp, *padded)

    # TODO(synk): for large B on v7x, add a ("parallel",) batch grid axis so both
    # TensorCores are used; unnecessary at these tiny shapes.
    return out.reshape(T, B, OP)[:, :, :O]


def _reference_forward(data, params, *, beta, threshold):
    """Pure-JAX reference of the same semantics (correctness sanity check)."""
    T, B, _ = data.shape
    mems = [jnp.zeros((B, w.shape[1]), jnp.float32) for w, _ in params]
    outs = []
    for t in range(T):
        x = data[t]
        new_mems = []
        for (w, b), m in zip(params, mems):
            cur = x @ w + b
            reset = (m - threshold > 0.0).astype(jnp.float32)
            m_new = beta * m + cur - reset * threshold
            x = (m_new - threshold > 0.0).astype(jnp.float32)
            new_mems.append(m_new)
        mems = new_mems
        outs.append(x)
    return jnp.stack(outs)


def _init_params(key, num_inputs, num_hidden, num_outputs, num_layers=4):
    """Deterministic init mimicking nn.Linear default (uniform +-1/sqrt(fan_in))."""
    dims = [num_inputs] + [num_hidden] * num_layers + [num_outputs]
    params = []
    for i in range(len(dims) - 1):
        fan_in, fan_out = dims[i], dims[i + 1]
        key, kw, kb = jax.random.split(key, 3)
        bound = 1.0 / jnp.sqrt(fan_in)
        w = jax.random.uniform(kw, (fan_in, fan_out), jnp.float32, -bound, bound)
        b = jax.random.uniform(kb, (1, fan_out), jnp.float32, -bound, bound)
        params.append((w, b))
    return params


if __name__ == "__main__":
    # Small shapes consistent with the module's forward:
    T, B = 8, 8                    # timestep, batch
    num_inputs, num_hidden, num_outputs = 32, 32, 16
    beta, threshold = 0.9, 1.0

    key = jax.random.PRNGKey(0)
    key, kd = jax.random.split(key)
    data = jax.random.normal(kd, (T, B, num_inputs), jnp.float32) * 2.0
    params = _init_params(key, num_inputs, num_hidden, num_outputs, num_layers=4)

    spk_rec = dynamic_snn_forward(data, params, beta=beta, threshold=threshold)
    spk_rec = jax.block_until_ready(spk_rec)

    ref = _reference_forward(data, params, beta=beta, threshold=threshold)
    assert spk_rec.shape == (T, B, num_outputs)
    assert jnp.allclose(spk_rec, ref, atol=1e-5), "mismatch vs. JAX reference"

    print("KERNEL_OK")
</pallas_src>

<mosaic_0001>
module attributes {stable_mosaic.version = 11 : i64} {
  func.func @_snn_kernel(%arg0: memref<64x128xf32, #tpu.memory_space<vmem>>, %arg1: memref<128x128xf32, #tpu.memory_space<vmem>>, %arg2: memref<1x128xf32, #tpu.memory_space<vmem>>, %arg3: memref<128x128xf32, #tpu.memory_space<vmem>>, %arg4: memref<1x128xf32, #tpu.memory_space<vmem>>, %arg5: memref<128x128xf32, #tpu.memory_space<vmem>>, %arg6: memref<1x128xf32, #tpu.memory_space<vmem>>, %arg7: memref<128x128xf32, #tpu.memory_space<vmem>>, %arg8: memref<1x128xf32, #tpu.memory_space<vmem>>, %arg9: memref<128x128xf32, #tpu.memory_space<vmem>>, %arg10: memref<1x128xf32, #tpu.memory_space<vmem>>, %arg11: memref<64x128xf32, #tpu.memory_space<vmem>>) attributes {dimension_semantics = [], scalar_prefetch = 0 : i64, scratch_operands = 0 : i64, tpu.core_type = #tpu.core_type<tc>} {
    %c0 = arith.constant 0 : index
    %c0_0 = arith.constant 0 : index
    %0 = vector.load %arg1[%c0, %c0_0] : memref<128x128xf32, #tpu.memory_space<vmem>>, vector<128x128xf32>
    %c0_1 = arith.constant 0 : index
    %c0_2 = arith.constant 0 : index
    %1 = vector.load %arg0[%c0_1, %c0_2] : memref<64x128xf32, #tpu.memory_space<vmem>>, vector<64x128xf32>
    %cst = arith.constant dense<0.000000e+00> : vector<64x128xf32>
    %2 = tpu.matmul %1, %0, %cst {dimension_numbers = #tpu.dot_dimension_numbers<[1], [0], [0], [1], [0, 0, 1, 1], [], []>} : vector<64x128xf32>, vector<128x128xf32>, vector<64x128xf32> -> vector<64x128xf32>
    %c0_3 = arith.constant 0 : index
    %c0_4 = arith.constant 0 : index
    %3 = vector.load %arg2[%c0_3, %c0_4] : memref<1x128xf32, #tpu.memory_space<vmem>>, vector<1x128xf32>
    %4 = vector.broadcast %3 : vector<1x128xf32> to vector<64x128xf32>
    %5 = arith.addf %2, %4 : vector<64x128xf32>
    %c0_5 = arith.constant 0 : index
    %c0_6 = arith.constant 0 : index
    %6 = vector.load %arg3[%c0_5, %c0_6] : memref<128x128xf32, #tpu.memory_space<vmem>>, vector<128x128xf32>
    %c0_7 = arith.constant 0 : index
    %c0_8 = arith.constant 0 : index
    %7 = vector.load %arg5[%c0_7, %c0_8] : memref<128x128xf32, #tpu.memory_space<vmem>>, vector<128x128xf32>
    %c0_9 = arith.constant 0 : index
    %c0_10 = arith.constant 0 : index
    %8 = vector.load %arg7[%c0_9, %c0_10] : memref<128x128xf32, #tpu.memory_space<vmem>>, vector<128x128xf32>
    %c0_11 = arith.constant 0 : index
    %c0_12 = arith.constant 0 : index
    %9 = vector.load %arg9[%c0_11, %c0_12] : memref<128x128xf32, #tpu.memory_space<vmem>>, vector<128x128xf32>
    %c0_13 = arith.constant 0 : index
    %c0_14 = arith.constant 0 : index
    %10 = vector.load %arg4[%c0_13, %c0_14] : memref<1x128xf32, #tpu.memory_space<vmem>>, vector<1x128xf32>
    %11 = vector.shape_cast %10 : vector<1x128xf32> to vector<1x128xf32>
    %12 = vector.broadcast %11 : vector<1x128xf32> to vector<8x128xf32>
    %c0_15 = arith.constant 0 : index
    %c0_16 = arith.constant 0 : index
    %13 = vector.load %arg6[%c0_15, %c0_16] : memref<1x128xf32, #tpu.memory_space<vmem>>, vector<1x128xf32>
    %14 = vector.shape_cast %13 : vector<1x128xf32> to vector<1x128xf32>
    %15 = vector.broadcast %14 : vector<1x128xf32> to vector<8x128xf32>
    %c0_17 = arith.constant 0 : index
    %c0_18 = arith.constant 0 : index
    %16 = vector.load %arg8[%c0_17, %c0_18] : memref<1x128xf32, #tpu.memory_space<vmem>>, vector<1x128xf32>
    %17 = vector.shape_cast %16 : vector<1x128xf32> to vector<1x128xf32>
    %18 = vector.broadcast %17 : vector<1x128xf32> to vector<8x128xf32>
    %c0_19 = arith.constant 0 : index
    %c0_20 = arith.constant 0 : index
    %19 = vector.load %arg10[%c0_19, %c0_20] : memref<1x128xf32, #tpu.memory_space<vmem>>, vector<1x128xf32>
    %20 = vector.shape_cast %19 : vector<1x128xf32> to vector<1x128xf32>
    %21 = vector.broadcast %20 : vector<1x128xf32> to vector<8x128xf32>
    %cst_21 = arith.constant 0.000000e+00 : f32
    %22 = vector.broadcast %cst_21 : f32 to vector<8x128xf32>
    %cst_22 = arith.constant 0.000000e+00 : f32
    %23 = vector.broadcast %cst_22 : f32 to vector<8x128xf32>
    %cst_23 = arith.constant 0.000000e+00 : f32
    %24 = vector.broadcast %cst_23 : f32 to vector<8x128xf32>
    %cst_24 = arith.constant 0.000000e+00 : f32
    %25 = vector.broadcast %cst_24 : f32 to vector<8x128xf32>
    %cst_25 = arith.constant 0.000000e+00 : f32
    %26 = vector.broadcast %cst_25 : f32 to vector<8x128xf32>
    %27 = vector.extract_strided_slice %5 {offsets = [0, 0], sizes = [8, 128], strides = [1, 1]} : vector<64x128xf32> to vector<8x128xf32>
    %cst_26 = arith.constant 0.899999976 : f32
    %28 = vector.broadcast %cst_26 : f32 to vector<8x128xf32>
    %29 = arith.mulf %28, %22 : vector<8x128xf32>
    %30 = arith.addf %29, %27 : vector<8x128xf32>
    %cst_27 = arith.constant 1.000000e+00 : f32
    %31 = vector.broadcast %cst_27 : f32 to vector<8x128xf32>
    %32 = arith.cmpf ogt, %22, %31 : vector<8x128xf32>
    %cst_28 = arith.constant 1.000000e+00 : f32
    %cst_29 = arith.constant 0.000000e+00 : f32
    %33 = vector.broadcast %cst_28 : f32 to vector<8x128xf32>
    %34 = vector.broadcast %cst_29 : f32 to vector<8x128xf32>
    %35 = arith.select %32, %33, %34 : vector<8x128xi1>, vector<8x128xf32>
    %36 = arith.subf %30, %35 : vector<8x128xf32>
    %cst_30 = arith.constant 1.000000e+00 : f32
    %37 = vector.broadcast %cst_30 : f32 to vector<8x128xf32>
    %38 = arith.cmpf ogt, %36, %37 : vector<8x128xf32>
    %cst_31 = arith.constant 1.000000e+00 : f32
    %cst_32 = arith.constant 0.000000e+00 : f32
    %39 = vector.broadcast %cst_31 : f32 to vector<8x128xf32>
    %40 = vector.broadcast %cst_32 : f32 to vector<8x128xf32>
    %41 = arith.select %38, %39, %40 : vector<8x128xi1>, vector<8x128xf32>
    %cst_33 = arith.constant dense<0.000000e+00> : vector<8x128xf32>
    %42 = tpu.matmul %41, %6, %cst_33 {dimension_numbers = #tpu.dot_dimension_numbers<[1], [0], [0], [1], [0, 0, 1, 1], [], []>} : vector<8x128xf32>, vector<128x128xf32>, vector<8x128xf32> -> vector<8x128xf32>
    %43 = arith.addf %42, %12 : vector<8x128xf32>
    %cst_34 = arith.constant 0.899999976 : f32
    %44 = vector.broadcast %cst_34 : f32 to vector<8x128xf32>
    %45 = arith.mulf %44, %23 : vector<8x128xf32>
    %46 = arith.addf %45, %43 : vector<8x128xf32>
    %cst_35 = arith.constant 1.000000e+00 : f32
    %47 = vector.broadcast %cst_35 : f32 to vector<8x128xf32>
    %48 = arith.cmpf ogt, %23, %47 : vector<8x128xf32>
    %cst_36 = arith.constant 1.000000e+00 : f32
    %cst_37 = arith.constant 0.000000e+00 : f32
    %49 = vector.broadcast %cst_36 : f32 to vector<8x128xf32>
    %50 = vector.broadcast %cst_37 : f32 to vector<8x128xf32>
    %51 = arith.select %48, %49, %50 : vector<8x128xi1>, vector<8x128xf32>
    %52 = arith.subf %46, %51 : vector<8x128xf32>
    %cst_38 = arith.constant 1.000000e+00 : f32
    %53 = vector.broadcast %cst_38 : f32 to vector<8x128xf32>
    %54 = arith.cmpf ogt, %52, %53 : vector<8x128xf32>
    %cst_39 = arith.constant 1.000000e+00 : f32
    %cst_40 = arith.constant 0.000000e+00 : f32
    %55 = vector.broadcast %cst_39 : f32 to vector<8x128xf32>
    %56 = vector.broadcast %cst_40 : f32 to vector<8x128xf32>
    %57 = arith.select %54, %55, %56 : vector<8x128xi1>, vector<8x128xf32>
    %cst_41 = arith.constant dense<0.000000e+00> : vector<8x128xf32>
    %58 = tpu.matmul %57, %7, %cst_41 {dimension_numbers = #tpu.dot_dimension_numbers<[1], [0], [0], [1], [0, 0, 1, 1], [], []>} : vector<8x128xf32>, vector<128x128xf32>, vector<8x128xf32> -> vector<8x128xf32>
    %59 = arith.addf %58, %15 : vector<8x128xf32>
    %cst_42 = arith.constant 0.899999976 : f32
    %60 = vector.broadcast %cst_42 : f32 to vector<8x128xf32>
    %61 = arith.mulf %60, %24 : vector<8x128xf32>
    %62 = arith.addf %61, %59 : vector<8x128xf32>
    %cst_43 = arith.constant 1.000000e+00 : f32
    %63 = vector.broadcast %cst_43 : f32 to vector<8x128xf32>
    %64 = arith.cmpf ogt, %24, %63 : vector<8x128xf32>
    %cst_44 = arith.constant 1.000000e+00 : f32
    %cst_45 = arith.constant 0.000000e+00 : f32
    %65 = vector.broadcast %cst_44 : f32 to vector<8x128xf32>
    %66 = vector.broadcast %cst_45 : f32 to vector<8x128xf32>
    %67 = arith.select %64, %65, %66 : vector<8x128xi1>, vector<8x128xf32>
    %68 = arith.subf %62, %67 : vector<8x128xf32>
    %cst_46 = arith.constant 1.000000e+00 : f32
    %69 = vector.broadcast %cst_46 : f32 to vector<8x128xf32>
    %70 = arith.cmpf ogt, %68, %69 : vector<8x128xf32>
    %cst_47 = arith.constant 1.000000e+00 : f32
    %cst_48 = arith.constant 0.000000e+00 : f32
    %71 = vector.broadcast %cst_47 : f32 to vector<8x128xf32>
    %72 = vector.broadcast %cst_48 : f32 to vector<8x128xf32>
    %73 = arith.select %70, %71, %72 : vector<8x128xi1>, vector<8x128xf32>
    %cst_49 = arith.constant dense<0.000000e+00> : vector<8x128xf32>
    %74 = tpu.matmul %73, %8, %cst_49 {dimension_numbers = #tpu.dot_dimension_numbers<[1], [0], [0], [1], [0, 0, 1, 1], [], []>} : vector<8x128xf32>, vector<128x128xf32>, vector<8x128xf32> -> vector<8x128xf32>
    %75 = arith.addf %74, %18 : vector<8x128xf32>
    %cst_50 = arith.constant 0.899999976 : f32
    %76 = vector.broadcast %cst_50 : f32 to vector<8x128xf32>
    %77 = arith.mulf %76, %25 : vector<8x128xf32>
    %78 = arith.addf %77, %75 : vector<8x128xf32>
    %cst_51 = arith.constant 1.000000e+00 : f32
    %79 = vector.broadcast %cst_51 : f32 to vector<8x128xf32>
    %80 = arith.cmpf ogt, %25, %79 : vector<8x128xf32>
    %cst_52 = arith.constant 1.000000e+00 : f32
    %cst_53 = arith.constant 0.000000e+00 : f32
    %81 = vector.broadcast %cst_52 : f32 to vector<8x128xf32>
    %82 = vector.broadcast %cst_53 : f32 to vector<8x128xf32>
    %83 = arith.select %80, %81, %82 : vector<8x128xi1>, vector<8x128xf32>
    %84 = arith.subf %78, %83 : vector<8x128xf32>
    %cst_54 = arith.constant 1.000000e+00 : f32
    %85 = vector.broadcast %cst_54 : f32 to vector<8x128xf32>
    %86 = arith.cmpf ogt, %84, %85 : vector<8x128xf32>
    %cst_55 = arith.constant 1.000000e+00 : f32
    %cst_56 = arith.constant 0.000000e+00 : f32
    %87 = vector.broadcast %cst_55 : f32 to vector<8x128xf32>
    %88 = vector.broadcast %cst_56 : f32 to vector<8x128xf32>
    %89 = arith.select %86, %87, %88 : vector<8x128xi1>, vector<8x128xf32>
    %cst_57 = arith.constant dense<0.000000e+00> : vector<8x128xf32>
    %90 = tpu.matmul %89, %9, %cst_57 {dimension_numbers = #tpu.dot_dimension_numbers<[1], [0], [0], [1], [0, 0, 1, 1], [], []>} : vector<8x128xf32>, vector<128x128xf32>, vector<8x128xf32> -> vector<8x128xf32>
    %91 = arith.addf %90, %21 : vector<8x128xf32>
    %cst_58 = arith.constant 0.899999976 : f32
    %92 = vector.broadcast %cst_58 : f32 to vector<8x128xf32>
    %93 = arith.mulf %92, %26 : vector<8x128xf32>
    %94 = arith.addf %93, %91 : vector<8x128xf32>
    %cst_59 = arith.constant 1.000000e+00 : f32
    %95 = vector.broadcast %cst_59 : f32 to vector<8x128xf32>
    %96 = arith.cmpf ogt, %26, %95 : vector<8x128xf32>
    %cst_60 = arith.constant 1.000000e+00 : f32
    %cst_61 = arith.constant 0.000000e+00 : f32
    %97 = vector.broadcast %cst_60 : f32 to vector<8x128xf32>
    %98 = vector.broadcast %cst_61 : f32 to vector<8x128xf32>
    %99 = arith.select %96, %97, %98 : vector<8x128xi1>, vector<8x128xf32>
    %100 = arith.subf %94, %99 : vector<8x128xf32>
    %cst_62 = arith.constant 1.000000e+00 : f32
    %101 = vector.broadcast %cst_62 : f32 to vector<8x128xf32>
    %102 = arith.cmpf ogt, %100, %101 : vector<8x128xf32>
    %cst_63 = arith.constant 1.000000e+00 : f32
    %cst_64 = arith.constant 0.000000e+00 : f32
    %103 = vector.broadcast %cst_63 : f32 to vector<8x128xf32>
    %104 = vector.broadcast %cst_64 : f32 to vector<8x128xf32>
    %105 = arith.select %102, %103, %104 : vector<8x128xi1>, vector<8x128xf32>
    %c0_65 = arith.constant 0 : index
    %c0_66 = arith.constant 0 : index
    %106 = vector.load %arg11[%c0_65, %c0_66] : memref<64x128xf32, #tpu.memory_space<vmem>>, vector<8x128xf32>
    tpu.vector_store %arg11[%c0_65, %c0_66], %105 {strides = array<i32>} : memref<64x128xf32, #tpu.memory_space<vmem>>, vector<8x128xf32>,
    %107 = vector.extract_strided_slice %5 {offsets = [8, 0], sizes = [8, 128], strides = [1, 1]} : vector<64x128xf32> to vector<8x128xf32>
    %cst_67 = arith.constant 0.899999976 : f32
    %108 = vector.broadcast %cst_67 : f32 to vector<8x128xf32>
    %109 = arith.mulf %108, %36 : vector<8x128xf32>
    %110 = arith.addf %109, %107 : vector<8x128xf32>
    %cst_68 = arith.constant 1.000000e+00 : f32
    %111 = vector.broadcast %cst_68 : f32 to vector<8x128xf32>
    %112 = arith.cmpf ogt, %36, %111 : vector<8x128xf32>
    %cst_69 = arith.constant 1.000000e+00 : f32
    %cst_70 = arith.constant 0.000000e+00 : f32
    %113 = vector.broadcast %cst_69 : f32 to vector<8x128xf32>
    %114 = vector.broadcast %cst_70 : f32 to vector<8x128xf32>
    %115 = arith.select %112, %113, %114 : vector<8x128xi1>, vector<8x128xf32>
    %116 = arith.subf %110, %115 : vector<8x128xf32>
    %cst_71 = arith.constant 1.000000e+00 : f32
    %117 = vector.broadcast %cst_71 : f32 to vector<8x128xf32>
    %118 = arith.cmpf ogt, %116, %117 : vector<8x128xf32>
    %cst_72 = arith.constant 1.000000e+00 : f32
    %cst_73 = arith.constant 0.000000e+00 : f32
    %119 = vector.broadcast %cst_72 : f32 to vector<8x128xf32>
    %120 = vector.broadcast %cst_73 : f32 to vector<8x128xf32>
    %121 = arith.select %118, %119, %120 : vector<8x128xi1>, vector<8x128xf32>
    %cst_74 = arith.constant dense<0.000000e+00> : vector<8x128xf32>
    %122 = tpu.matmul %121, %6, %cst_74 {dimension_numbers = #tpu.dot_dimension_numbers<[1], [0], [0], [1], [0, 0, 1, 1], [], []>} : vector<8x128xf32>, vector<128x128xf32>, vector<8x128xf32> -> vector<8x128xf32>
    %123 = arith.addf %122, %12 : vector<8x128xf32>
    %cst_75 = arith.constant 0.899999976 : f32
    %124 = vector.broadcast %cst_75 : f32 to vector<8x128xf32>
    %125 = arith.mulf %124, %52 : vector<8x128xf32>
    %126 = arith.addf %125, %123 : vector<8x128xf32>
    %cst_76 = arith.constant 1.000000e+00 : f32
    %127 = vector.broadcast %cst_76 : f32 to vector<8x128xf32>
    %128 = arith.cmpf ogt, %52, %127 : vector<8x128xf32>
    %cst_77 = arith.constant 1.000000e+00 : f32
    %cst_78 = arith.constant 0.000000e+00 : f32
    %129 = vector.broadcast %cst_77 : f32 to vector<8x128xf32>
    %130 = vector.broadcast %cst_78 : f32 to vector<8x128xf32>
    %131 = arith.select %128, %129, %130 : vector<8x128xi1>, vector<8x128xf32>
    %132 = arith.subf %126, %131 : vector<8x128xf32>
    %cst_79 = arith.constant 1.000000e+00 : f32
    %133 = vector.broadcast %cst_79 : f32 to vector<8x128xf32>
    %134 = arith.cmpf ogt, %132, %133 : vector<8x128xf32>
    %cst_80 = arith.constant 1.000000e+00 : f32
    %cst_81 = arith.constant 0.000000e+00 : f32
    %135 = vector.broadcast %cst_80 : f32 to vector<8x128xf32>
    %136 = vector.broadcast %cst_81 : f32 to vector<8x128xf32>
    %137 = arith.select %134, %135, %136 : vector<8x128xi1>, vector<8x128xf32>
    %cst_82 = arith.constant dense<0.000000e+00> : vector<8x128xf32>
    %138 = tpu.matmul %137, %7, %cst_82 {dimension_numbers = #tpu.dot_dimension_numbers<[1], [0], [0], [1], [0, 0, 1, 1], [], []>} : vector<8x128xf32>, vector<128x128xf32>, vector<8x128xf32> -> vector<8x128xf32>
    %139 = arith.addf %138, %15 : vector<8x128xf32>
    %cst_83 = arith.constant 0.899999976 : f32
    %140 = vector.broadcast %cst_83 : f32 to vector<8x128xf32>
    %141 = arith.mulf %140, %68 : vector<8x128xf32>
    %142 = arith.addf %141, %139 : vector<8x128xf32>
    %cst_84 = arith.constant 1.000000e+00 : f32
    %143 = vector.broadcast %cst_84 : f32 to vector<8x128xf32>
    %144 = arith.cmpf ogt, %68, %143 : vector<8x128xf32>
    %cst_85 = arith.constant 1.000000e+00 : f32
    %cst_86 = arith.constant 0.000000e+00 : f32
    %145 = vector.broadcast %cst_85 : f32 to vector<8x128xf32>
    %146 = vector.broadcast %cst_86 : f32 to vector<8x128xf32>
    %147 = arith.select %144, %145, %146 : vector<8x128xi1>, vector<8x128xf32>
    %148 = arith.subf %142, %147 : vector<8x128xf32>
    %cst_87 = arith.constant 1.000000e+00 : f32
    %149 = vector.broadcast %cst_87 : f32 to vector<8x128xf32>
    %150 = arith.cmpf ogt, %148, %149 : vector<8x128xf32>
    %cst_88 = arith.constant 1.000000e+00 : f32
    %cst_89 = arith.constant 0.000000e+00 : f32
    %151 = vector.broadcast %cst_88 : f32 to vector<8x128xf32>
    %152 = vector.broadcast %cst_89 : f32 to vector<8x128xf32>
    %153 = arith.select %150, %151, %152 : vector<8x128xi1>, vector<8x128xf32>
    %cst_90 = arith.constant dense<0.000000e+00> : vector<8x128xf32>
    %154 = tpu.matmul %153, %8, %cst_90 {dimension_numbers = #tpu.dot_dimension_numbers<[1], [0], [0], [1], [0, 0, 1, 1], [], []>} : vector<8x128xf32>, vector<128x128xf32>, vector<8x128xf32> -> vector<8x128xf32>
    %155 = arith.addf %154, %18 : vector<8x128xf32>
    %cst_91 = arith.constant 0.899999976 : f32
    %156 = vector.broadcast %cst_91 : f32 to vector<8x128xf32>
    %157 = arith.mulf %156, %84 : vector<8x128xf32>
    %158 = arith.addf %157, %155 : vector<8x128xf32>
    %cst_92 = arith.constant 1.000000e+00 : f32
    %159 = vector.broadcast %cst_92 : f32 to vector<8x128xf32>
    %160 = arith.cmpf ogt, %84, %159 : vector<8x128xf32>
    %cst_93 = arith.constant 1.000000e+00 : f32
    %cst_94 = arith.constant 0.000000e+00 : f32
    %161 = vector.broadcast %cst_93 : f32 to vector<8x128xf32>
    %162 = vector.broadcast %cst_94 : f32 to vector<8x128xf32>
    %163 = arith.select %160, %161, %162 : vector<8x128xi1>, vector<8x128xf32>
    %164 = arith.subf %158, %163 : vector<8x128xf32>
    %cst_95 = arith.constant 1.000000e+00 : f32
    %165 = vector.broadcast %cst_95 : f32 to vector<8x128xf32>
    %166 = arith.cmpf ogt, %164, %165 : vector<8x128xf32>
    %cst_96 = arith.constant 1.000000e+00 : f32
    %cst_97 = arith.constant 0.000000e+00 : f32
    %167 = vector.broadcast %cst_96 : f32 to vector<8x128xf32>
    %168 = vector.broadcast %cst_97 : f32 to vector<8x128xf32>
    %169 = arith.select %166, %167, %168 : vector<8x128xi1>, vector<8x128xf32>
    %cst_98 = arith.constant dense<0.000000e+00> : vector<8x128xf32>
    %170 = tpu.matmul %169, %9, %cst_98 {dimension_numbers = #tpu.dot_dimension_numbers<[1], [0], [0], [1], [0, 0, 1, 1], [], []>} : vector<8x128xf32>, vector<128x128xf32>, vector<8x128xf32> -> vector<8x128xf32>
    %171 = arith.addf %170, %21 : vector<8x128xf32>
    %cst_99 = arith.constant 0.899999976 : f32
    %172 = vector.broadcast %cst_99 : f32 to vector<8x128xf32>
    %173 = arith.mulf %172, %100 : vector<8x128xf32>
    %174 = arith.addf %173, %171 : vector<8x128xf32>
    %cst_100 = arith.constant 1.000000e+00 : f32
    %175 = vector.broadcast %cst_100 : f32 to vector<8x128xf32>
    %176 = arith.cmpf ogt, %100, %175 : vector<8x128xf32>
    %cst_101 = arith.constant 1.000000e+00 : f32
    %cst_102 = arith.constant 0.000000e+00 : f32
    %177 = vector.broadcast %cst_101 : f32 to vector<8x128xf32>
    %178 = vector.broadcast %cst_102 : f32 to vector<8x128xf32>
    %179 = arith.select %176, %177, %178 : vector<8x128xi1>, vector<8x128xf32>
    %180 = arith.subf %174, %179 : vector<8x128xf32>
    %cst_103 = arith.constant 1.000000e+00 : f32
    %181 = vector.broadcast %cst_103 : f32 to vector<8x128xf32>
    %182 = arith.cmpf ogt, %180, %181 : vector<8x128xf32>
    %cst_104 = arith.constant 1.000000e+00 : f32
    %cst_105 = arith.constant 0.000000e+00 : f32
    %183 = vector.broadcast %cst_104 : f32 to vector<8x128xf32>
    %184 = vector.broadcast %cst_105 : f32 to vector<8x128xf32>
    %185 = arith.select %182, %183, %184 : vector<8x128xi1>, vector<8x128xf32>
    %c8 = arith.constant 8 : index
    %c0_106 = arith.constant 0 : index
    %186 = vector.load %arg11[%c8, %c0_106] : memref<64x128xf32, #tpu.memory_space<vmem>>, vector<8x128xf32>
    tpu.vector_store %arg11[%c8, %c0_106], %185 {strides = array<i32>} : memref<64x128xf32, #tpu.memory_space<vmem>>, vector<8x128xf32>,
    %187 = vector.extract_strided_slice %5 {offsets = [16, 0], sizes = [8, 128], strides = [1, 1]} : vector<64x128xf32> to vector<8x128xf32>
    %cst_107 = arith.constant 0.899999976 : f32
    %188 = vector.broadcast %cst_107 : f32 to vector<8x128xf32>
    %189 = arith.mulf %188, %116 : vector<8x128xf32>
    %190 = arith.addf %189, %187 : vector<8x128xf32>
    %cst_108 = arith.constant 1.000000e+00 : f32
    %191 = vector.broadcast %cst_108 : f32 to vector<8x128xf32>
    %192 = arith.cmpf ogt, %116, %191 : vector<8x128xf32>
    %cst_109 = arith.constant 1.000000e+00 : f32
    %cst_110 = arith.constant 0.000000e+00 : f32
    %193 = vector.broadcast %cst_109 : f32 to vector<8x128xf32>
    %194 = vector.broadcast %cst_110 : f32 to vector<8x128xf32>
    %195 = arith.select %192, %193, %194 : vector<8x128xi1>, vector<8x128xf32>
    %196 = arith.subf %190, %195 : vector<8x128xf32>
    %cst_111 = arith.constant 1.000000e+00 : f32
    %197 = vector.broadcast %cst_111 : f32 to vector<8x128xf32>
    %198 = arith.cmpf ogt, %196, %197 : vector<8x128xf32>
    %cst_112 = arith.constant 1.000000e+00 : f32
    %cst_113 = arith.constant 0.000000e+00 : f32
    %199 = vector.broadcast %cst_112 : f32 to vector<8x128xf32>
    %200 = vector.broadcast %cst_113 : f32 to vector<8x128xf32>
    %201 = arith.select %198, %199, %200 : vector<8x128xi1>, vector<8x128xf32>
    %cst_114 = arith.constant dense<0.000000e+00> : vector<8x128xf32>
    %202 = tpu.matmul %201, %6, %cst_114 {dimension_numbers = #tpu.dot_dimension_numbers<[1], [0], [0], [1], [0, 0, 1, 1], [], []>} : vector<8x128xf32>, vector<128x128xf32>, vector<8x128xf32> -> vector<8x128xf32>
    %203 = arith.addf %202, %12 : vector<8x128xf32>
    %cst_115 = arith.constant 0.899999976 : f32
    %204 = vector.broadcast %cst_115 : f32 to vector<8x128xf32>
    %205 = arith.mulf %204, %132 : vector<8x128xf32>
    %206 = arith.addf %205, %203 : vector<8x128xf32>
    %cst_116 = arith.constant 1.000000e+00 : f32
    %207 = vector.broadcast %cst_116 : f32 to vector<8x128xf32>
    %208 = arith.cmpf ogt, %132, %207 : vector<8x128xf32>
    %cst_117 = arith.constant 1.000000e+00 : f32
    %cst_118 = arith.constant 0.000000e+00 : f32
    %209 = vector.broadcast %cst_117 : f32 to vector<8x128xf32>
    %210 = vector.broadcast %cst_118 : f32 to vector<8x128xf32>
    %211 = arith.select %208, %209, %210 : vector<8x128xi1>, vector<8x128xf32>
    %212 = arith.subf %206, %211 : vector<8x128xf32>
    %cst_119 = arith.constant 1.000000e+00 : f32
    %213 = vector.broadcast %cst_119 : f32 to vector<8x128xf32>
    %214 = arith.cmpf ogt, %212, %213 : vector<8x128xf32>
    %cst_120 = arith.constant 1.000000e+00 : f32
    %cst_121 = arith.constant 0.000000e+00 : f32
    %215 = vector.broadcast %cst_120 : f32 to vector<8x128xf32>
    %216 = vector.broadcast %cst_121 : f32 to vector<8x128xf32>
    %217 = arith.select %214, %215, %216 : vector<8x128xi1>, vector<8x128xf32>
    %cst_122 = arith.constant dense<0.000000e+00> : vector<8x128xf32>
    %218 = tpu.matmul %217, %7, %cst_122 {dimension_numbers = #tpu.dot_dimension_numbers<[1], [0], [0], [1], [0, 0, 1, 1], [], []>} : vector<8x128xf32>, vector<128x128xf32>, vector<8x128xf32> -> vector<8x128xf32>
    %219 = arith.addf %218, %15 : vector<8x128xf32>
    %cst_123 = arith.constant 0.899999976 : f32
    %220 = vector.broadcast %cst_123 : f32 to vector<8x128xf32>
    %221 = arith.mulf %220, %148 : vector<8x128xf32>
    %222 = arith.addf %221, %219 : vector<8x128xf32>
    %cst_124 = arith.constant 1.000000e+00 : f32
    %223 = vector.broadcast %cst_124 : f32 to vector<8x128xf32>
    %224 = arith.cmpf ogt, %148, %223 : vector<8x128xf32>
    %cst_125 = arith.constant 1.000000e+00 : f32
    %cst_126 = arith.constant 0.000000e+00 : f32
    %225 = vector.broadcast %cst_125 : f32 to vector<8x128xf32>
    %226 = vector.broadcast %cst_126 : f32 to vector<8x128xf32>
    %227 = arith.select %224, %225, %226 : vector<8x128xi1>, vector<8x128xf32>
    %228 = arith.subf %222, %227 : vector<8x128xf32>
    %cst_127 = arith.constant 1.000000e+00 : f32
    %229 = vector.broadcast %cst_127 : f32 to vector<8x128xf32>
    %230 = arith.cmpf ogt, %228, %229 : vector<8x128xf32>
    %cst_128 = arith.constant 1.000000e+00 : f32
    %cst_129 = arith.constant 0.000000e+00 : f32
    %231 = vector.broadcast %cst_128 : f32 to vector<8x128xf32>
    %232 = vector.broadcast %cst_129 : f32 to vector<8x128xf32>
    %233 = arith.select %230, %231, %232 : vector<8x128xi1>, vector<8x128xf32>
    %cst_130 = arith.constant dense<0.000000e+00> : vector<8x128xf32>
    %234 = tpu.matmul %233, %8, %cst_130 {dimension_numbers = #tpu.dot_dimension_numbers<[1], [0], [0], [1], [0, 0, 1, 1], [], []>} : vector<8x128xf32>, vector<128x128xf32>, vector<8x128xf32> -> vector<8x128xf32>
    %235 = arith.addf %234, %18 : vector<8x128xf32>
    %cst_131 = arith.constant 0.899999976 : f32
    %236 = vector.broadcast %cst_131 : f32 to vector<8x128xf32>
    %237 = arith.mulf %236, %164 : vector<8x128xf32>
    %238 = arith.addf %237, %235 : vector<8x128xf32>
    %cst_132 = arith.constant 1.000000e+00 : f32
    %239 = vector.broadcast %cst_132 : f32 to vector<8x128xf32>
    %240 = arith.cmpf ogt, %164, %239 : vector<8x128xf32>
    %cst_133 = arith.constant 1.000000e+00 : f32
    %cst_134 = arith.constant 0.000000e+00 : f32
    %241 = vector.broadcast %cst_133 : f32 to vector<8x128xf32>
    %242 = vector.broadcast %cst_134 : f32 to vector<8x128xf32>
    %243 = arith.select %240, %241, %242 : vector<8x128xi1>, vector<8x128xf32>
    %244 = arith.subf %238, %243 : vector<8x128xf32>
    %cst_135 = arith.constant 1.000000e+00 : f32
    %245 = vector.broadcast %cst_135 : f32 to vector<8x128xf32>
    %246 = arith.cmpf ogt, %244, %245 : vector<8x128xf32>
    %cst_136 = arith.constant 1.000000e+00 : f32
    %cst_137 = arith.constant 0.000000e+00 : f32
    %247 = vector.broadcast %cst_136 : f32 to vector<8x128xf32>
    %248 = vector.broadcast %cst_137 : f32 to vector<8x128xf32>
    %249 = arith.select %246, %247, %248 : vector<8x128xi1>, vector<8x128xf32>
    %cst_138 = arith.constant dense<0.000000e+00> : vector<8x128xf32>
    %250 = tpu.matmul %249, %9, %cst_138 {dimension_numbers = #tpu.dot_dimension_numbers<[1], [0], [0], [1], [0, 0, 1, 1], [], []>} : vector<8x128xf32>, vector<128x128xf32>, vector<8x128xf32> -> vector<8x128xf32>
    %251 = arith.addf %250, %21 : vector<8x128xf32>
    %cst_139 = arith.constant 0.899999976 : f32
    %252 = vector.broadcast %cst_139 : f32 to vector<8x128xf32>
    %253 = arith.mulf %252, %180 : vector<8x128xf32>
    %254 = arith.addf %253, %251 : vector<8x128xf32>
    %cst_140 = arith.constant 1.000000e+00 : f32
    %255 = vector.broadcast %cst_140 : f32 to vector<8x128xf32>
    %256 = arith.cmpf ogt, %180, %255 : vector<8x128xf32>
    %cst_141 = arith.constant 1.000000e+00 : f32
    %cst_142 = arith.constant 0.000000e+00 : f32
    %257 = vector.broadcast %cst_141 : f32 to vector<8x128xf32>
    %258 = vector.broadcast %cst_142 : f32 to vector<8x128xf32>
    %259 = arith.select %256, %257, %258 : vector<8x128xi1>, vector<8x128xf32>
    %260 = arith.subf %254, %259 : vector<8x128xf32>
    %cst_143 = arith.constant 1.000000e+00 : f32
    %261 = vector.broadcast %cst_143 : f32 to vector<8x128xf32>
    %262 = arith.cmpf ogt, %260, %261 : vector<8x128xf32>
    %cst_144 = arith.constant 1.000000e+00 : f32
    %cst_145 = arith.constant 0.000000e+00 : f32
    %263 = vector.broadcast %cst_144 : f32 to vector<8x128xf32>
    %264 = vector.broadcast %cst_145 : f32 to vector<8x128xf32>
    %265 = arith.select %262, %263, %264 : vector<8x128xi1>, vector<8x128xf32>
    %c16 = arith.constant 16 : index
    %c0_146 = arith.constant 0 : index
    %266 = vector.load %arg11[%c16, %c0_146] : memref<64x128xf32, #tpu.memory_space<vmem>>, vector<8x128xf32>
    tpu.vector_store %arg11[%c16, %c0_146], %265 {strides = array<i32>} : memref<64x128xf32, #tpu.memory_space<vmem>>, vector<8x128xf32>,
    %267 = vector.extract_strided_slice %5 {offsets = [24, 0], sizes = [8, 128], strides = [1, 1]} : vector<64x128xf32> to vector<8x128xf32>
    %cst_147 = arith.constant 0.899999976 : f32
    %268 = vector.broadcast %cst_147 : f32 to vector<8x128xf32>
    %269 = arith.mulf %268, %196 : vector<8x128xf32>
    %270 = arith.addf %269, %267 : vector<8x128xf32>
    %cst_148 = arith.constant 1.000000e+00 : f32
    %271 = vector.broadcast %cst_148 : f32 to vector<8x128xf32>
    %272 = arith.cmpf ogt, %196, %271 : vector<8x128xf32>
    %cst_149 = arith.constant 1.000000e+00 : f32
    %cst_150 = arith.constant 0.000000e+00 : f32
    %273 = vector.broadcast %cst_149 : f32 to vector<8x128xf32>
    %274 = vector.broadcast %cst_150 : f32 to vector<8x128xf32>
    %275 = arith.select %272, %273, %274 : vector<8x128xi1>, vector<8x128xf32>
    %276 = arith.subf %270, %275 : vector<8x128xf32>
    %cst_151 = arith.constant 1.000000e+00 : f32
    %277 = vector.broadcast %cst_151 : f32 to vector<8x128xf32>
    %278 = arith.cmpf ogt, %276, %277 : vector<8x128xf32>
    %cst_152 = arith.constant 1.000000e+00 : f32
    %cst_153 = arith.constant 0.000000e+00 : f32
    %279 = vector.broadcast %cst_152 : f32 to vector<8x128xf32>
    %280 = vector.broadcast %cst_153 : f32 to vector<8x128xf32>
    %281 = arith.select %278, %279, %280 : vector<8x128xi1>, vector<8x128xf32>
    %cst_154 = arith.constant dense<0.000000e+00> : vector<8x128xf32>
    %282 = tpu.matmul %281, %6, %cst_154 {dimension_numbers = #tpu.dot_dimension_numbers<[1], [0], [0], [1], [0, 0, 1, 1], [], []>} : vector<8x128xf32>, vector<128x128xf32>, vector<8x128xf32> -> vector<8x128xf32>
    %283 = arith.addf %282, %12 : vector<8x128xf32>
    %cst_155 = arith.constant 0.899999976 : f32
    %284 = vector.broadcast %cst_155 : f32 to vector<8x128xf32>
    %285 = arith.mulf %284, %212 : vector<8x128xf32>
    %286 = arith.addf %285, %283 : vector<8x128xf32>
    %cst_156 = arith.constant 1.000000e+00 : f32
    %287 = vector.broadcast %cst_156 : f32 to vector<8x128xf32>
    %288 = arith.cmpf ogt, %212, %287 : vector<8x128xf32>
    %cst_157 = arith.constant 1.000000e+00 : f32
    %cst_158 = arith.constant 0.000000e+00 : f32
    %289 = vector.broadcast %cst_157 : f32 to vector<8x128xf32>
    %290 = vector.broadcast %cst_158 : f32 to vector<8x128xf32>
    %291 = arith.select %288, %289, %290 : vector<8x128xi1>, vector<8x128xf32>
    %292 = arith.subf %286, %291 : vector<8x128xf32>
    %cst_159 = arith.constant 1.000000e+00 : f32
    %293 = vector.broadcast %cst_159 : f32 to vector<8x128xf32>
    %294 = arith.cmpf ogt, %292, %293 : vector<8x128xf32>
    %cst_160 = arith.constant 1.000000e+00 : f32
    %cst_161 = arith.constant 0.000000e+00 : f32
    %295 = vector.broadcast %cst_160 : f32 to vector<8x128xf32>
    %296 = vector.broadcast %cst_161 : f32 to vector<8x128xf32>
    %297 = arith.select %294, %295, %296 : vector<8x128xi1>, vector<8x128xf32>
    %cst_162 = arith.constant dense<0.000000e+00> : vector<8x128xf32>
    %298 = tpu.matmul %297, %7, %cst_162 {dimension_numbers = #tpu.dot_dimension_numbers<[1], [0], [0], [1], [0, 0, 1, 1], [], []>} : vector<8x128xf32>, vector<128x128xf32>, vector<8x128xf32> -> vector<8x128xf32>
    %299 = arith.addf %298, %15 : vector<8x128xf32>
    %cst_163 = arith.constant 0.899999976 : f32
    %300 = vector.broadcast %cst_163 : f32 to vector<8x128xf32>
    %301 = arith.mulf %300, %228 : vector<8x128xf32>
    %302 = arith.addf %301, %299 : vector<8x128xf32>
    %cst_164 = arith.constant 1.000000e+00 : f32
    %303 = vector.broadcast %cst_164 : f32 to vector<8x128xf32>
    %304 = arith.cmpf ogt, %228, %303 : vector<8x128xf32>
    %cst_165 = arith.constant 1.000000e+00 : f32
    %cst_166 = arith.constant 0.000000e+00 : f32
    %305 = vector.broadcast %cst_165 : f32 to vector<8x128xf32>
    %306 = vector.broadcast %cst_166 : f32 to vector<8x128xf32>
    %307 = arith.select %304, %305, %306 : vector<8x128xi1>, vector<8x128xf32>
    %308 = arith.subf %302, %307 : vector<8x128xf32>
    %cst_167 = arith.constant 1.000000e+00 : f32
    %309 = vector.broadcast %cst_167 : f32 to vector<8x128xf32>
    %310 = arith.cmpf ogt, %308, %309 : vector<8x128xf32>
    %cst_168 = arith.constant 1.000000e+00 : f32
    %cst_169 = arith.constant 0.000000e+00 : f32
    %311 = vector.broadcast %cst_168 : f32 to vector<8x128xf32>
    %312 = vector.broadcast %cst_169 : f32 to vector<8x128xf32>
    %313 = arith.select %310, %311, %312 : vector<8x128xi1>, vector<8x128xf32>
    %cst_170 = arith.constant dense<0.000000e+00> : vector<8x128xf32>
    %314 = tpu.matmul %313, %8, %cst_170 {dimension_numbers = #tpu.dot_dimension_numbers<[1], [0], [0], [1], [0, 0, 1, 1], [], []>} : vector<8x128xf32>, vector<128x128xf32>, vector<8x128xf32> -> vector<8x128xf32>
    %315 = arith.addf %314, %18 : vector<8x128xf32>
    %cst_171 = arith.constant 0.899999976 : f32
    %316 = vector.broadcast %cst_171 : f32 to vector<8x128xf32>
    %317 = arith.mulf %316, %244 : vector<8x128xf32>
    %318 = arith.addf %317, %315 : vector<8x128xf32>
    %cst_172 = arith.constant 1.000000e+00 : f32
    %319 = vector.broadcast %cst_172 : f32 to vector<8x128xf32>
    %320 = arith.cmpf ogt, %244, %319 : vector<8x128xf32>
    %cst_173 = arith.constant 1.000000e+00 : f32
    %cst_174 = arith.constant 0.000000e+00 : f32
    %321 = vector.broadcast %cst_173 : f32 to vector<8x128xf32>
    %322 = vector.broadcast %cst_174 : f32 to vector<8x128xf32>
    %323 = arith.select %320, %321, %322 : vector<8x128xi1>, vector<8x128xf32>
    %324 = arith.subf %318, %323 : vector<8x128xf32>
    %cst_175 = arith.constant 1.000000e+00 : f32
    %325 = vector.broadcast %cst_175 : f32 to vector<8x128xf32>
    %326 = arith.cmpf ogt, %324, %325 : vector<8x128xf32>
    %cst_176 = arith.constant 1.000000e+00 : f32
    %cst_177 = arith.constant 0.000000e+00 : f32
    %327 = vector.broadcast %cst_176 : f32 to vector<8x128xf32>
    %328 = vector.broadcast %cst_177 : f32 to vector<8x128xf32>
    %329 = arith.select %326, %327, %328 : vector<8x128xi1>, vector<8x128xf32>
    %cst_178 = arith.constant dense<0.000000e+00> : vector<8x128xf32>
    %330 = tpu.matmul %329, %9, %cst_178 {dimension_numbers = #tpu.dot_dimension_numbers<[1], [0], [0], [1], [0, 0, 1, 1], [], []>} : vector<8x128xf32>, vector<128x128xf32>, vector<8x128xf32> -> vector<8x128xf32>
    %331 = arith.addf %330, %21 : vector<8x128xf32>
    %cst_179 = arith.constant 0.899999976 : f32
    %332 = vector.broadcast %cst_179 : f32 to vector<8x128xf32>
    %333 = arith.mulf %332, %260 : vector<8x128xf32>
    %334 = arith.addf %333, %331 : vector<8x128xf32>
    %cst_180 = arith.constant 1.000000e+00 : f32
    %335 = vector.broadcast %cst_180 : f32 to vector<8x128xf32>
    %336 = arith.cmpf ogt, %260, %335 : vector<8x128xf32>
    %cst_181 = arith.constant 1.000000e+00 : f32
    %cst_182 = arith.constant 0.000000e+00 : f32
    %337 = vector.broadcast %cst_181 : f32 to vector<8x128xf32>
    %338 = vector.broadcast %cst_182 : f32 to vector<8x128xf32>
    %339 = arith.select %336, %337, %338 : vector<8x128xi1>, vector<8x128xf32>
    %340 = arith.subf %334, %339 : vector<8x128xf32>
    %cst_183 = arith.constant 1.000000e+00 : f32
    %341 = vector.broadcast %cst_183 : f32 to vector<8x128xf32>
    %342 = arith.cmpf ogt, %340, %341 : vector<8x128xf32>
    %cst_184 = arith.constant 1.000000e+00 : f32
    %cst_185 = arith.constant 0.000000e+00 : f32
    %343 = vector.broadcast %cst_184 : f32 to vector<8x128xf32>
    %344 = vector.broadcast %cst_185 : f32 to vector<8x128xf32>
    %345 = arith.select %342, %343, %344 : vector<8x128xi1>, vector<8x128xf32>
    %c24 = arith.constant 24 : index
    %c0_186 = arith.constant 0 : index
    %346 = vector.load %arg11[%c24, %c0_186] : memref<64x128xf32, #tpu.memory_space<vmem>>, vector<8x128xf32>
    tpu.vector_store %arg11[%c24, %c0_186], %345 {strides = array<i32>} : memref<64x128xf32, #tpu.memory_space<vmem>>, vector<8x128xf32>,
    %347 = vector.extract_strided_slice %5 {offsets = [32, 0], sizes = [8, 128], strides = [1, 1]} : vector<64x128xf32> to vector<8x128xf32>
    %cst_187 = arith.constant 0.899999976 : f32
    %348 = vector.broadcast %cst_187 : f32 to vector<8x128xf32>
    %349 = arith.mulf %348, %276 : vector<8x128xf32>
    %350 = arith.addf %349, %347 : vector<8x128xf32>
    %cst_188 = arith.constant 1.000000e+00 : f32
    %351 = vector.broadcast %cst_188 : f32 to vector<8x128xf32>
    %352 = arith.cmpf ogt, %276, %351 : vector<8x128xf32>
    %cst_189 = arith.constant 1.000000e+00 : f32
    %cst_190 = arith.constant 0.000000e+00 : f32
    %353 = vector.broadcast %cst_189 : f32 to vector<8x128xf32>
    %354 = vector.broadcast %cst_190 : f32 to vector<8x128xf32>
    %355 = arith.select %352, %353, %354 : vector<8x128xi1>, vector<8x128xf32>
    %356 = arith.subf %350, %355 : vector<8x128xf32>
    %cst_191 = arith.constant 1.000000e+00 : f32
    %357 = vector.broadcast %cst_191 : f32 to vector<8x128xf32>
    %358 = arith.cmpf ogt, %356, %357 : vector<8x128xf32>
    %cst_192 = arith.constant 1.000000e+00 : f32
    %cst_193 = arith.constant 0.000000e+00 : f32
    %359 = vector.broadcast %cst_192 : f32 to vector<8x128xf32>
    %360 = vector.broadcast %cst_193 : f32 to vector<8x128xf32>
    %361 = arith.select %358, %359, %360 : vector<8x128xi1>, vector<8x128xf32>
    %cst_194 = arith.constant dense<0.000000e+00> : vector<8x128xf32>
    %362 = tpu.matmul %361, %6, %cst_194 {dimension_numbers = #tpu.dot_dimension_numbers<[1], [0], [0], [1], [0, 0, 1, 1], [], []>} : vector<8x128xf32>, vector<128x128xf32>, vector<8x128xf32> -> vector<8x128xf32>
    %363 = arith.addf %362, %12 : vector<8x128xf32>
    %cst_195 = arith.constant 0.899999976 : f32
    %364 = vector.broadcast %cst_195 : f32 to vector<8x128xf32>
    %365 = arith.mulf %364, %292 : vector<8x128xf32>
    %366 = arith.addf %365, %363 : vector<8x128xf32>
    %cst_196 = arith.constant 1.000000e+00 : f32
    %367 = vector.broadcast %cst_196 : f32 to vector<8x128xf32>
    %368 = arith.cmpf ogt, %292, %367 : vector<8x128xf32>
    %cst_197 = arith.constant 1.000000e+00 : f32
    %cst_198 = arith.constant 0.000000e+00 : f32
    %369 = vector.broadcast %cst_197 : f32 to vector<8x128xf32>
    %370 = vector.broadcast %cst_198 : f32 to vector<8x128xf32>
    %371 = arith.select %368, %369, %370 : vector<8x128xi1>, vector<8x128xf32>
    %372 = arith.subf %366, %371 : vector<8x128xf32>
    %cst_199 = arith.constant 1.000000e+00 : f32
    %373 = vector.broadcast %cst_199 : f32 to vector<8x128xf32>
    %374 = arith.cmpf ogt, %372, %373 : vector<8x128xf32>
    %cst_200 = arith.constant 1.000000e+00 : f32
    %cst_201 = arith.constant 0.000000e+00 : f32
    %375 = vector.broadcast %cst_200 : f32 to vector<8x128xf32>
    %376 = vector.broadcast %cst_201 : f32 to vector<8x128xf32>
    %377 = arith.select %374, %375, %376 : vector<8x128xi1>, vector<8x128xf32>
    %cst_202 = arith.constant dense<0.000000e+00> : vector<8x128xf32>
    %378 = tpu.matmul %377, %7, %cst_202 {dimension_numbers = #tpu.dot_dimension_numbers<[1], [0], [0], [1], [0, 0, 1, 1], [], []>} : vector<8x128xf32>, vector<128x128xf32>, vector<8x128xf32> -> vector<8x128xf32>
    %379 = arith.addf %378, %15 : vector<8x128xf32>
    %cst_203 = arith.constant 0.899999976 : f32
    %380 = vector.broadcast %cst_203 : f32 to vector<8x128xf32>
    %381 = arith.mulf %380, %308 : vector<8x128xf32>
    %382 = arith.addf %381, %379 : vector<8x128xf32>
    %cst_204 = arith.constant 1.000000e+00 : f32
    %383 = vector.broadcast %cst_204 : f32 to vector<8x128xf32>
    %384 = arith.cmpf ogt, %308, %383 : vector<8x128xf32>
    %cst_205 = arith.constant 1.000000e+00 : f32
    %cst_206 = arith.constant 0.000000e+00 : f32
    %385 = vector.broadcast %cst_205 : f32 to vector<8x128xf32>
    %386 = vector.broadcast %cst_206 : f32 to vector<8x128xf32>
    %387 = arith.select %384, %385, %386 : vector<8x128xi1>, vector<8x128xf32>
    %388 = arith.subf %382, %387 : vector<8x128xf32>
    %cst_207 = arith.constant 1.000000e+00 : f32
    %389 = vector.broadcast %cst_207 : f32 to vector<8x128xf32>
    %390 = arith.cmpf ogt, %388, %389 : vector<8x128xf32>
    %cst_208 = arith.constant 1.000000e+00 : f32
    %cst_209 = arith.constant 0.000000e+00 : f32
    %391 = vector.broadcast %cst_208 : f32 to vector<8x128xf32>
    %392 = vector.broadcast %cst_209 : f32 to vector<8x128xf32>
    %393 = arith.select %390, %391, %392 : vector<8x128xi1>, vector<8x128xf32>
    %cst_210 = arith.constant dense<0.000000e+00> : vector<8x128xf32>
    %394 = tpu.matmul %393, %8, %cst_210 {dimension_numbers = #tpu.dot_dimension_numbers<[1], [0], [0], [1], [0, 0, 1, 1], [], []>} : vector<8x128xf32>, vector<128x128xf32>, vector<8x128xf32> -> vector<8x128xf32>
    %395 = arith.addf %394, %18 : vector<8x128xf32>
    %cst_211 = arith.constant 0.899999976 : f32
    %396 = vector.broadcast %cst_211 : f32 to vector<8x128xf32>
    %397 = arith.mulf %396, %324 : vector<8x128xf32>
    %398 = arith.addf %397, %395 : vector<8x128xf32>
    %cst_212 = arith.constant 1.000000e+00 : f32
    %399 = vector.broadcast %cst_212 : f32 to vector<8x128xf32>
    %400 = arith.cmpf ogt, %324, %399 : vector<8x128xf32>
    %cst_213 = arith.constant 1.000000e+00 : f32
    %cst_214 = arith.constant 0.000000e+00 : f32
    %401 = vector.broadcast %cst_213 : f32 to vector<8x128xf32>
    %402 = vector.broadcast %cst_214 : f32 to vector<8x128xf32>
    %403 = arith.select %400, %401, %402 : vector<8x128xi1>, vector<8x128xf32>
    %404 = arith.subf %398, %403 : vector<8x128xf32>
    %cst_215 = arith.constant 1.000000e+00 : f32
    %405 = vector.broadcast %cst_215 : f32 to vector<8x128xf32>
    %406 = arith.cmpf ogt, %404, %405 : vector<8x128xf32>
    %cst_216 = arith.constant 1.000000e+00 : f32
    %cst_217 = arith.constant 0.000000e+00 : f32
    %407 = vector.broadcast %cst_216 : f32 to vector<8x128xf32>
    %408 = vector.broadcast %cst_217 : f32 to vector<8x128xf32>
    %409 = arith.select %406, %407, %408 : vector<8x128xi1>, vector<8x128xf32>
    %cst_218 = arith.constant dense<0.000000e+00> : vector<8x128xf32>
    %410 = tpu.matmul %409, %9, %cst_218 {dimension_numbers = #tpu.dot_dimension_numbers<[1], [0], [0], [1], [0, 0, 1, 1], [], []>} : vector<8x128xf32>, vector<128x128xf32>, vector<8x128xf32> -> vector<8x128xf32>
    %411 = arith.addf %410, %21 : vector<8x128xf32>
    %cst_219 = arith.constant 0.899999976 : f32
    %412 = vector.broadcast %cst_219 : f32 to vector<8x128xf32>
    %413 = arith.mulf %412, %340 : vector<8x128xf32>
    %414 = arith.addf %413, %411 : vector<8x128xf32>
    %cst_220 = arith.constant 1.000000e+00 : f32
    %415 = vector.broadcast %cst_220 : f32 to vector<8x128xf32>
    %416 = arith.cmpf ogt, %340, %415 : vector<8x128xf32>
    %cst_221 = arith.constant 1.000000e+00 : f32
    %cst_222 = arith.constant 0.000000e+00 : f32
    %417 = vector.broadcast %cst_221 : f32 to vector<8x128xf32>
    %418 = vector.broadcast %cst_222 : f32 to vector<8x128xf32>
    %419 = arith.select %416, %417, %418 : vector<8x128xi1>, vector<8x128xf32>
    %420 = arith.subf %414, %419 : vector<8x128xf32>
    %cst_223 = arith.constant 1.000000e+00 : f32
    %421 = vector.broadcast %cst_223 : f32 to vector<8x128xf32>
    %422 = arith.cmpf ogt, %420, %421 : vector<8x128xf32>
    %cst_224 = arith.constant 1.000000e+00 : f32
    %cst_225 = arith.constant 0.000000e+00 : f32
    %423 = vector.broadcast %cst_224 : f32 to vector<8x128xf32>
    %424 = vector.broadcast %cst_225 : f32 to vector<8x128xf32>
    %425 = arith.select %422, %423, %424 : vector<8x128xi1>, vector<8x128xf32>
    %c32 = arith.constant 32 : index
    %c0_226 = arith.constant 0 : index
    %426 = vector.load %arg11[%c32, %c0_226] : memref<64x128xf32, #tpu.memory_space<vmem>>, vector<8x128xf32>
    tpu.vector_store %arg11[%c32, %c0_226], %425 {strides = array<i32>} : memref<64x128xf32, #tpu.memory_space<vmem>>, vector<8x128xf32>,
    %427 = vector.extract_strided_slice %5 {offsets = [40, 0], sizes = [8, 128], strides = [1, 1]} : vector<64x128xf32> to vector<8x128xf32>
    %cst_227 = arith.constant 0.899999976 : f32
    %428 = vector.broadcast %cst_227 : f32 to vector<8x128xf32>
    %429 = arith.mulf %428, %356 : vector<8x128xf32>
    %430 = arith.addf %429, %427 : vector<8x128xf32>
    %cst_228 = arith.constant 1.000000e+00 : f32
    %431 = vector.broadcast %cst_228 : f32 to vector<8x128xf32>
    %432 = arith.cmpf ogt, %356, %431 : vector<8x128xf32>
    %cst_229 = arith.constant 1.000000e+00 : f32
    %cst_230 = arith.constant 0.000000e+00 : f32
    %433 = vector.broadcast %cst_229 : f32 to vector<8x128xf32>
    %434 = vector.broadcast %cst_230 : f32 to vector<8x128xf32>
    %435 = arith.select %432, %433, %434 : vector<8x128xi1>, vector<8x128xf32>
    %436 = arith.subf %430, %435 : vector<8x128xf32>
    %cst_231 = arith.constant 1.000000e+00 : f32
    %437 = vector.broadcast %cst_231 : f32 to vector<8x128xf32>
    %438 = arith.cmpf ogt, %436, %437 : vector<8x128xf32>
    %cst_232 = arith.constant 1.000000e+00 : f32
    %cst_233 = arith.constant 0.000000e+00 : f32
    %439 = vector.broadcast %cst_232 : f32 to vector<8x128xf32>
    %440 = vector.broadcast %cst_233 : f32 to vector<8x128xf32>
    %441 = arith.select %438, %439, %440 : vector<8x128xi1>, vector<8x128xf32>
    %cst_234 = arith.constant dense<0.000000e+00> : vector<8x128xf32>
    %442 = tpu.matmul %441, %6, %cst_234 {dimension_numbers = #tpu.dot_dimension_numbers<[1], [0], [0], [1], [0, 0, 1, 1], [], []>} : vector<8x128xf32>, vector<128x128xf32>, vector<8x128xf32> -> vector<8x128xf32>
    %443 = arith.addf %442, %12 : vector<8x128xf32>
    %cst_235 = arith.constant 0.899999976 : f32
    %444 = vector.broadcast %cst_235 : f32 to vector<8x128xf32>
    %445 = arith.mulf %444, %372 : vector<8x128xf32>
    %446 = arith.addf %445, %443 : vector<8x128xf32>
    %cst_236 = arith.constant 1.000000e+00 : f32
    %447 = vector.broadcast %cst_236 : f32 to vector<8x128xf32>
    %448 = arith.cmpf ogt, %372, %447 : vector<8x128xf32>
    %cst_237 = arith.constant 1.000000e+00 : f32
    %cst_238 = arith.constant 0.000000e+00 : f32
    %449 = vector.broadcast %cst_237 : f32 to vector<8x128xf32>
    %450 = vector.broadcast %cst_238 : f32 to vector<8x128xf32>
    %451 = arith.select %448, %449, %450 : vector<8x128xi1>, vector<8x128xf32>
    %452 = arith.subf %446, %451 : vector<8x128xf32>
    %cst_239 = arith.constant 1.000000e+00 : f32
    %453 = vector.broadcast %cst_239 : f32 to vector<8x128xf32>
    %454 = arith.cmpf ogt, %452, %453 : vector<8x128xf32>
    %cst_240 = arith.constant 1.000000e+00 : f32
    %cst_241 = arith.constant 0.000000e+00 : f32
    %455 = vector.broadcast %cst_240 : f32 to vector<8x128xf32>
    %456 = vector.broadcast %cst_241 : f32 to vector<8x128xf32>
    %457 = arith.select %454, %455, %456 : vector<8x128xi1>, vector<8x128xf32>
    %cst_242 = arith.constant dense<0.000000e+00> : vector<8x128xf32>
    %458 = tpu.matmul %457, %7, %cst_242 {dimension_numbers = #tpu.dot_dimension_numbers<[1], [0], [0], [1], [0, 0, 1, 1], [], []>} : vector<8x128xf32>, vector<128x128xf32>, vector<8x128xf32> -> vector<8x128xf32>
    %459 = arith.addf %458, %15 : vector<8x128xf32>
    %cst_243 = arith.constant 0.899999976 : f32
    %460 = vector.broadcast %cst_243 : f32 to vector<8x128xf32>
    %461 = arith.mulf %460, %388 : vector<8x128xf32>
    %462 = arith.addf %461, %459 : vector<8x128xf32>
    %cst_244 = arith.constant 1.000000e+00 : f32
    %463 = vector.broadcast %cst_244 : f32 to vector<8x128xf32>
    %464 = arith.cmpf ogt, %388, %463 : vector<8x128xf32>
    %cst_245 = arith.constant 1.000000e+00 : f32
    %cst_246 = arith.constant 0.000000e+00 : f32
    %465 = vector.broadcast %cst_245 : f32 to vector<8x128xf32>
    %466 = vector.broadcast %cst_246 : f32 to vector<8x128xf32>
    %467 = arith.select %464, %465, %466 : vector<8x128xi1>, vector<8x128xf32>
    %468 = arith.subf %462, %467 : vector<8x128xf32>
    %cst_247 = arith.constant 1.000000e+00 : f32
    %469 = vector.broadcast %cst_247 : f32 to vector<8x128xf32>
    %470 = arith.cmpf ogt, %468, %469 : vector<8x128xf32>
    %cst_248 = arith.constant 1.000000e+00 : f32
    %cst_249 = arith.constant 0.000000e+00 : f32
    %471 = vector.broadcast %cst_248 : f32 to vector<8x128xf32>
    %472 = vector.broadcast %cst_249 : f32 to vector<8x128xf32>
    %473 = arith.select %470, %471, %472 : vector<8x128xi1>, vector<8x128xf32>
    %cst_250 = arith.constant dense<0.000000e+00> : vector<8x128xf32>
    %474 = tpu.matmul %473, %8, %cst_250 {dimension_numbers = #tpu.dot_dimension_numbers<[1], [0], [0], [1], [0, 0, 1, 1], [], []>} : vector<8x128xf32>, vector<128x128xf32>, vector<8x128xf32> -> vector<8x128xf32>
    %475 = arith.addf %474, %18 : vector<8x128xf32>
    %cst_251 = arith.constant 0.899999976 : f32
    %476 = vector.broadcast %cst_251 : f32 to vector<8x128xf32>
    %477 = arith.mulf %476, %404 : vector<8x128xf32>
    %478 = arith.addf %477, %475 : vector<8x128xf32>
    %cst_252 = arith.constant 1.000000e+00 : f32
    %479 = vector.broadcast %cst_252 : f32 to vector<8x128xf32>
    %480 = arith.cmpf ogt, %404, %479 : vector<8x128xf32>
    %cst_253 = arith.constant 1.000000e+00 : f32
    %cst_254 = arith.constant 0.000000e+00 : f32
    %481 = vector.broadcast %cst_253 : f32 to vector<8x128xf32>
    %482 = vector.broadcast %cst_254 : f32 to vector<8x128xf32>
    %483 = arith.select %480, %481, %482 : vector<8x128xi1>, vector<8x128xf32>
    %484 = arith.subf %478, %483 : vector<8x128xf32>
    %cst_255 = arith.constant 1.000000e+00 : f32
    %485 = vector.broadcast %cst_255 : f32 to vector<8x128xf32>
    %486 = arith.cmpf ogt, %484, %485 : vector<8x128xf32>
    %cst_256 = arith.constant 1.000000e+00 : f32
    %cst_257 = arith.constant 0.000000e+00 : f32
    %487 = vector.broadcast %cst_256 : f32 to vector<8x128xf32>
    %488 = vector.broadcast %cst_257 : f32 to vector<8x128xf32>
    %489 = arith.select %486, %487, %488 : vector<8x128xi1>, vector<8x128xf32>
    %cst_258 = arith.constant dense<0.000000e+00> : vector<8x128xf32>
    %490 = tpu.matmul %489, %9, %cst_258 {dimension_numbers = #tpu.dot_dimension_numbers<[1], [0], [0], [1], [0, 0, 1, 1], [], []>} : vector<8x128xf32>, vector<128x128xf32>, vector<8x128xf32> -> vector<8x128xf32>
    %491 = arith.addf %490, %21 : vector<8x128xf32>
    %cst_259 = arith.constant 0.899999976 : f32
    %492 = vector.broadcast %cst_259 : f32 to vector<8x128xf32>
    %493 = arith.mulf %492, %420 : vector<8x128xf32>
    %494 = arith.addf %493, %491 : vector<8x128xf32>
    %cst_260 = arith.constant 1.000000e+00 : f32
    %495 = vector.broadcast %cst_260 : f32 to vector<8x128xf32>
    %496 = arith.cmpf ogt, %420, %495 : vector<8x128xf32>
    %cst_261 = arith.constant 1.000000e+00 : f32
    %cst_262 = arith.constant 0.000000e+00 : f32
    %497 = vector.broadcast %cst_261 : f32 to vector<8x128xf32>
    %498 = vector.broadcast %cst_262 : f32 to vector<8x128xf32>
    %499 = arith.select %496, %497, %498 : vector<8x128xi1>, vector<8x128xf32>
    %500 = arith.subf %494, %499 : vector<8x128xf32>
    %cst_263 = arith.constant 1.000000e+00 : f32
    %501 = vector.broadcast %cst_263 : f32 to vector<8x128xf32>
    %502 = arith.cmpf ogt, %500, %501 : vector<8x128xf32>
    %cst_264 = arith.constant 1.000000e+00 : f32
    %cst_265 = arith.constant 0.000000e+00 : f32
    %503 = vector.broadcast %cst_264 : f32 to vector<8x128xf32>
    %504 = vector.broadcast %cst_265 : f32 to vector<8x128xf32>
    %505 = arith.select %502, %503, %504 : vector<8x128xi1>, vector<8x128xf32>
    %c40 = arith.constant 40 : index
    %c0_266 = arith.constant 0 : index
    %506 = vector.load %arg11[%c40, %c0_266] : memref<64x128xf32, #tpu.memory_space<vmem>>, vector<8x128xf32>
    tpu.vector_store %arg11[%c40, %c0_266], %505 {strides = array<i32>} : memref<64x128xf32, #tpu.memory_space<vmem>>, vector<8x128xf32>,
    %507 = vector.extract_strided_slice %5 {offsets = [48, 0], sizes = [8, 128], strides = [1, 1]} : vector<64x128xf32> to vector<8x128xf32>
    %cst_267 = arith.constant 0.899999976 : f32
    %508 = vector.broadcast %cst_267 : f32 to vector<8x128xf32>
    %509 = arith.mulf %508, %436 : vector<8x128xf32>
    %510 = arith.addf %509, %507 : vector<8x128xf32>
    %cst_268 = arith.constant 1.000000e+00 : f32
    %511 = vector.broadcast %cst_268 : f32 to vector<8x128xf32>
    %512 = arith.cmpf ogt, %436, %511 : vector<8x128xf32>
    %cst_269 = arith.constant 1.000000e+00 : f32
    %cst_270 = arith.constant 0.000000e+00 : f32
    %513 = vector.broadcast %cst_269 : f32 to vector<8x128xf32>
    %514 = vector.broadcast %cst_270 : f32 to vector<8x128xf32>
    %515 = arith.select %512, %513, %514 : vector<8x128xi1>, vector<8x128xf32>
    %516 = arith.subf %510, %515 : vector<8x128xf32>
    %cst_271 = arith.constant 1.000000e+00 : f32
    %517 = vector.broadcast %cst_271 : f32 to vector<8x128xf32>
    %518 = arith.cmpf ogt, %516, %517 : vector<8x128xf32>
    %cst_272 = arith.constant 1.000000e+00 : f32
    %cst_273 = arith.constant 0.000000e+00 : f32
    %519 = vector.broadcast %cst_272 : f32 to vector<8x128xf32>
    %520 = vector.broadcast %cst_273 : f32 to vector<8x128xf32>
    %521 = arith.select %518, %519, %520 : vector<8x128xi1>, vector<8x128xf32>
    %cst_274 = arith.constant dense<0.000000e+00> : vector<8x128xf32>
    %522 = tpu.matmul %521, %6, %cst_274 {dimension_numbers = #tpu.dot_dimension_numbers<[1], [0], [0], [1], [0, 0, 1, 1], [], []>} : vector<8x128xf32>, vector<128x128xf32>, vector<8x128xf32> -> vector<8x128xf32>
    %523 = arith.addf %522, %12 : vector<8x128xf32>
    %cst_275 = arith.constant 0.899999976 : f32
    %524 = vector.broadcast %cst_275 : f32 to vector<8x128xf32>
    %525 = arith.mulf %524, %452 : vector<8x128xf32>
    %526 = arith.addf %525, %523 : vector<8x128xf32>
    %cst_276 = arith.constant 1.000000e+00 : f32
    %527 = vector.broadcast %cst_276 : f32 to vector<8x128xf32>
    %528 = arith.cmpf ogt, %452, %527 : vector<8x128xf32>
    %cst_277 = arith.constant 1.000000e+00 : f32
    %cst_278 = arith.constant 0.000000e+00 : f32
    %529 = vector.broadcast %cst_277 : f32 to vector<8x128xf32>
    %530 = vector.broadcast %cst_278 : f32 to vector<8x128xf32>
    %531 = arith.select %528, %529, %530 : vector<8x128xi1>, vector<8x128xf32>
    %532 = arith.subf %526, %531 : vector<8x128xf32>
    %cst_279 = arith.constant 1.000000e+00 : f32
    %533 = vector.broadcast %cst_279 : f32 to vector<8x128xf32>
    %534 = arith.cmpf ogt, %532, %533 : vector<8x128xf32>
    %cst_280 = arith.constant 1.000000e+00 : f32
    %cst_281 = arith.constant 0.000000e+00 : f32
    %535 = vector.broadcast %cst_280 : f32 to vector<8x128xf32>
    %536 = vector.broadcast %cst_281 : f32 to vector<8x128xf32>
    %537 = arith.select %534, %535, %536 : vector<8x128xi1>, vector<8x128xf32>
    %cst_282 = arith.constant dense<0.000000e+00> : vector<8x128xf32>
    %538 = tpu.matmul %537, %7, %cst_282 {dimension_numbers = #tpu.dot_dimension_numbers<[1], [0], [0], [1], [0, 0, 1, 1], [], []>} : vector<8x128xf32>, vector<128x128xf32>, vector<8x128xf32> -> vector<8x128xf32>
    %539 = arith.addf %538, %15 : vector<8x128xf32>
    %cst_283 = arith.constant 0.899999976 : f32
    %540 = vector.broadcast %cst_283 : f32 to vector<8x128xf32>
    %541 = arith.mulf %540, %468 : vector<8x128xf32>
    %542 = arith.addf %541, %539 : vector<8x128xf32>
    %cst_284 = arith.constant 1.000000e+00 : f32
    %543 = vector.broadcast %cst_284 : f32 to vector<8x128xf32>
    %544 = arith.cmpf ogt, %468, %543 : vector<8x128xf32>
    %cst_285 = arith.constant 1.000000e+00 : f32
    %cst_286 = arith.constant 0.000000e+00 : f32
    %545 = vector.broadcast %cst_285 : f32 to vector<8x128xf32>
    %546 = vector.broadcast %cst_286 : f32 to vector<8x128xf32>
    %547 = arith.select %544, %545, %546 : vector<8x128xi1>, vector<8x128xf32>
    %548 = arith.subf %542, %547 : vector<8x128xf32>
    %cst_287 = arith.constant 1.000000e+00 : f32
    %549 = vector.broadcast %cst_287 : f32 to vector<8x128xf32>
    %550 = arith.cmpf ogt, %548, %549 : vector<8x128xf32>
    %cst_288 = arith.constant 1.000000e+00 : f32
    %cst_289 = arith.constant 0.000000e+00 : f32
    %551 = vector.broadcast %cst_288 : f32 to vector<8x128xf32>
    %552 = vector.broadcast %cst_289 : f32 to vector<8x128xf32>
    %553 = arith.select %550, %551, %552 : vector<8x128xi1>, vector<8x128xf32>
    %cst_290 = arith.constant dense<0.000000e+00> : vector<8x128xf32>
    %554 = tpu.matmul %553, %8, %cst_290 {dimension_numbers = #tpu.dot_dimension_numbers<[1], [0], [0], [1], [0, 0, 1, 1], [], []>} : vector<8x128xf32>, vector<128x128xf32>, vector<8x128xf32> -> vector<8x128xf32>
    %555 = arith.addf %554, %18 : vector<8x128xf32>
    %cst_291 = arith.constant 0.899999976 : f32
    %556 = vector.broadcast %cst_291 : f32 to vector<8x128xf32>
    %557 = arith.mulf %556, %484 : vector<8x128xf32>
    %558 = arith.addf %557, %555 : vector<8x128xf32>
    %cst_292 = arith.constant 1.000000e+00 : f32
    %559 = vector.broadcast %cst_292 : f32 to vector<8x128xf32>
    %560 = arith.cmpf ogt, %484, %559 : vector<8x128xf32>
    %cst_293 = arith.constant 1.000000e+00 : f32
    %cst_294 = arith.constant 0.000000e+00 : f32
    %561 = vector.broadcast %cst_293 : f32 to vector<8x128xf32>
    %562 = vector.broadcast %cst_294 : f32 to vector<8x128xf32>
    %563 = arith.select %560, %561, %562 : vector<8x128xi1>, vector<8x128xf32>
    %564 = arith.subf %558, %563 : vector<8x128xf32>
    %cst_295 = arith.constant 1.000000e+00 : f32
    %565 = vector.broadcast %cst_295 : f32 to vector<8x128xf32>
    %566 = arith.cmpf ogt, %564, %565 : vector<8x128xf32>
    %cst_296 = arith.constant 1.000000e+00 : f32
    %cst_297 = arith.constant 0.000000e+00 : f32
    %567 = vector.broadcast %cst_296 : f32 to vector<8x128xf32>
    %568 = vector.broadcast %cst_297 : f32 to vector<8x128xf32>
    %569 = arith.select %566, %567, %568 : vector<8x128xi1>, vector<8x128xf32>
    %cst_298 = arith.constant dense<0.000000e+00> : vector<8x128xf32>
    %570 = tpu.matmul %569, %9, %cst_298 {dimension_numbers = #tpu.dot_dimension_numbers<[1], [0], [0], [1], [0, 0, 1, 1], [], []>} : vector<8x128xf32>, vector<128x128xf32>, vector<8x128xf32> -> vector<8x128xf32>
    %571 = arith.addf %570, %21 : vector<8x128xf32>
    %cst_299 = arith.constant 0.899999976 : f32
    %572 = vector.broadcast %cst_299 : f32 to vector<8x128xf32>
    %573 = arith.mulf %572, %500 : vector<8x128xf32>
    %574 = arith.addf %573, %571 : vector<8x128xf32>
    %cst_300 = arith.constant 1.000000e+00 : f32
    %575 = vector.broadcast %cst_300 : f32 to vector<8x128xf32>
    %576 = arith.cmpf ogt, %500, %575 : vector<8x128xf32>
    %cst_301 = arith.constant 1.000000e+00 : f32
    %cst_302 = arith.constant 0.000000e+00 : f32
    %577 = vector.broadcast %cst_301 : f32 to vector<8x128xf32>
    %578 = vector.broadcast %cst_302 : f32 to vector<8x128xf32>
    %579 = arith.select %576, %577, %578 : vector<8x128xi1>, vector<8x128xf32>
    %580 = arith.subf %574, %579 : vector<8x128xf32>
    %cst_303 = arith.constant 1.000000e+00 : f32
    %581 = vector.broadcast %cst_303 : f32 to vector<8x128xf32>
    %582 = arith.cmpf ogt, %580, %581 : vector<8x128xf32>
    %cst_304 = arith.constant 1.000000e+00 : f32
    %cst_305 = arith.constant 0.000000e+00 : f32
    %583 = vector.broadcast %cst_304 : f32 to vector<8x128xf32>
    %584 = vector.broadcast %cst_305 : f32 to vector<8x128xf32>
    %585 = arith.select %582, %583, %584 : vector<8x128xi1>, vector<8x128xf32>
    %c48 = arith.constant 48 : index
    %c0_306 = arith.constant 0 : index
    %586 = vector.load %arg11[%c48, %c0_306] : memref<64x128xf32, #tpu.memory_space<vmem>>, vector<8x128xf32>
    tpu.vector_store %arg11[%c48, %c0_306], %585 {strides = array<i32>} : memref<64x128xf32, #tpu.memory_space<vmem>>, vector<8x128xf32>,
    %587 = vector.extract_strided_slice %5 {offsets = [56, 0], sizes = [8, 128], strides = [1, 1]} : vector<64x128xf32> to vector<8x128xf32>
    %cst_307 = arith.constant 0.899999976 : f32
    %588 = vector.broadcast %cst_307 : f32 to vector<8x128xf32>
    %589 = arith.mulf %588, %516 : vector<8x128xf32>
    %590 = arith.addf %589, %587 : vector<8x128xf32>
    %cst_308 = arith.constant 1.000000e+00 : f32
    %591 = vector.broadcast %cst_308 : f32 to vector<8x128xf32>
    %592 = arith.cmpf ogt, %516, %591 : vector<8x128xf32>
    %cst_309 = arith.constant 1.000000e+00 : f32
    %cst_310 = arith.constant 0.000000e+00 : f32
    %593 = vector.broadcast %cst_309 : f32 to vector<8x128xf32>
    %594 = vector.broadcast %cst_310 : f32 to vector<8x128xf32>
    %595 = arith.select %592, %593, %594 : vector<8x128xi1>, vector<8x128xf32>
    %596 = arith.subf %590, %595 : vector<8x128xf32>
    %cst_311 = arith.constant 1.000000e+00 : f32
    %597 = vector.broadcast %cst_311 : f32 to vector<8x128xf32>
    %598 = arith.cmpf ogt, %596, %597 : vector<8x128xf32>
    %cst_312 = arith.constant 1.000000e+00 : f32
    %cst_313 = arith.constant 0.000000e+00 : f32
    %599 = vector.broadcast %cst_312 : f32 to vector<8x128xf32>
    %600 = vector.broadcast %cst_313 : f32 to vector<8x128xf32>
    %601 = arith.select %598, %599, %600 : vector<8x128xi1>, vector<8x128xf32>
    %cst_314 = arith.constant dense<0.000000e+00> : vector<8x128xf32>
    %602 = tpu.matmul %601, %6, %cst_314 {dimension_numbers = #tpu.dot_dimension_numbers<[1], [0], [0], [1], [0, 0, 1, 1], [], []>} : vector<8x128xf32>, vector<128x128xf32>, vector<8x128xf32> -> vector<8x128xf32>
    %603 = arith.addf %602, %12 : vector<8x128xf32>
    %cst_315 = arith.constant 0.899999976 : f32
    %604 = vector.broadcast %cst_315 : f32 to vector<8x128xf32>
    %605 = arith.mulf %604, %532 : vector<8x128xf32>
    %606 = arith.addf %605, %603 : vector<8x128xf32>
    %cst_316 = arith.constant 1.000000e+00 : f32
    %607 = vector.broadcast %cst_316 : f32 to vector<8x128xf32>
    %608 = arith.cmpf ogt, %532, %607 : vector<8x128xf32>
    %cst_317 = arith.constant 1.000000e+00 : f32
    %cst_318 = arith.constant 0.000000e+00 : f32
    %609 = vector.broadcast %cst_317 : f32 to vector<8x128xf32>
    %610 = vector.broadcast %cst_318 : f32 to vector<8x128xf32>
    %611 = arith.select %608, %609, %610 : vector<8x128xi1>, vector<8x128xf32>
    %612 = arith.subf %606, %611 : vector<8x128xf32>
    %cst_319 = arith.constant 1.000000e+00 : f32
    %613 = vector.broadcast %cst_319 : f32 to vector<8x128xf32>
    %614 = arith.cmpf ogt, %612, %613 : vector<8x128xf32>
    %cst_320 = arith.constant 1.000000e+00 : f32
    %cst_321 = arith.constant 0.000000e+00 : f32
    %615 = vector.broadcast %cst_320 : f32 to vector<8x128xf32>
    %616 = vector.broadcast %cst_321 : f32 to vector<8x128xf32>
    %617 = arith.select %614, %615, %616 : vector<8x128xi1>, vector<8x128xf32>
    %cst_322 = arith.constant dense<0.000000e+00> : vector<8x128xf32>
    %618 = tpu.matmul %617, %7, %cst_322 {dimension_numbers = #tpu.dot_dimension_numbers<[1], [0], [0], [1], [0, 0, 1, 1], [], []>} : vector<8x128xf32>, vector<128x128xf32>, vector<8x128xf32> -> vector<8x128xf32>
    %619 = arith.addf %618, %15 : vector<8x128xf32>
    %cst_323 = arith.constant 0.899999976 : f32
    %620 = vector.broadcast %cst_323 : f32 to vector<8x128xf32>
    %621 = arith.mulf %620, %548 : vector<8x128xf32>
    %622 = arith.addf %621, %619 : vector<8x128xf32>
    %cst_324 = arith.constant 1.000000e+00 : f32
    %623 = vector.broadcast %cst_324 : f32 to vector<8x128xf32>
    %624 = arith.cmpf ogt, %548, %623 : vector<8x128xf32>
    %cst_325 = arith.constant 1.000000e+00 : f32
    %cst_326 = arith.constant 0.000000e+00 : f32
    %625 = vector.broadcast %cst_325 : f32 to vector<8x128xf32>
    %626 = vector.broadcast %cst_326 : f32 to vector<8x128xf32>
    %627 = arith.select %624, %625, %626 : vector<8x128xi1>, vector<8x128xf32>
    %628 = arith.subf %622, %627 : vector<8x128xf32>
    %cst_327 = arith.constant 1.000000e+00 : f32
    %629 = vector.broadcast %cst_327 : f32 to vector<8x128xf32>
    %630 = arith.cmpf ogt, %628, %629 : vector<8x128xf32>
    %cst_328 = arith.constant 1.000000e+00 : f32
    %cst_329 = arith.constant 0.000000e+00 : f32
    %631 = vector.broadcast %cst_328 : f32 to vector<8x128xf32>
    %632 = vector.broadcast %cst_329 : f32 to vector<8x128xf32>
    %633 = arith.select %630, %631, %632 : vector<8x128xi1>, vector<8x128xf32>
    %cst_330 = arith.constant dense<0.000000e+00> : vector<8x128xf32>
    %634 = tpu.matmul %633, %8, %cst_330 {dimension_numbers = #tpu.dot_dimension_numbers<[1], [0], [0], [1], [0, 0, 1, 1], [], []>} : vector<8x128xf32>, vector<128x128xf32>, vector<8x128xf32> -> vector<8x128xf32>
    %635 = arith.addf %634, %18 : vector<8x128xf32>
    %cst_331 = arith.constant 0.899999976 : f32
    %636 = vector.broadcast %cst_331 : f32 to vector<8x128xf32>
    %637 = arith.mulf %636, %564 : vector<8x128xf32>
    %638 = arith.addf %637, %635 : vector<8x128xf32>
    %cst_332 = arith.constant 1.000000e+00 : f32
    %639 = vector.broadcast %cst_332 : f32 to vector<8x128xf32>
    %640 = arith.cmpf ogt, %564, %639 : vector<8x128xf32>
    %cst_333 = arith.constant 1.000000e+00 : f32
    %cst_334 = arith.constant 0.000000e+00 : f32
    %641 = vector.broadcast %cst_333 : f32 to vector<8x128xf32>
    %642 = vector.broadcast %cst_334 : f32 to vector<8x128xf32>
    %643 = arith.select %640, %641, %642 : vector<8x128xi1>, vector<8x128xf32>
    %644 = arith.subf %638, %643 : vector<8x128xf32>
    %cst_335 = arith.constant 1.000000e+00 : f32
    %645 = vector.broadcast %cst_335 : f32 to vector<8x128xf32>
    %646 = arith.cmpf ogt, %644, %645 : vector<8x128xf32>
    %cst_336 = arith.constant 1.000000e+00 : f32
    %cst_337 = arith.constant 0.000000e+00 : f32
    %647 = vector.broadcast %cst_336 : f32 to vector<8x128xf32>
    %648 = vector.broadcast %cst_337 : f32 to vector<8x128xf32>
    %649 = arith.select %646, %647, %648 : vector<8x128xi1>, vector<8x128xf32>
    %cst_338 = arith.constant dense<0.000000e+00> : vector<8x128xf32>
    %650 = tpu.matmul %649, %9, %cst_338 {dimension_numbers = #tpu.dot_dimension_numbers<[1], [0], [0], [1], [0, 0, 1, 1], [], []>} : vector<8x128xf32>, vector<128x128xf32>, vector<8x128xf32> -> vector<8x128xf32>
    %651 = arith.addf %650, %21 : vector<8x128xf32>
    %cst_339 = arith.constant 0.899999976 : f32
    %652 = vector.broadcast %cst_339 : f32 to vector<8x128xf32>
    %653 = arith.mulf %652, %580 : vector<8x128xf32>
    %654 = arith.addf %653, %651 : vector<8x128xf32>
    %cst_340 = arith.constant 1.000000e+00 : f32
    %655 = vector.broadcast %cst_340 : f32 to vector<8x128xf32>
    %656 = arith.cmpf ogt, %580, %655 : vector<8x128xf32>
    %cst_341 = arith.constant 1.000000e+00 : f32
    %cst_342 = arith.constant 0.000000e+00 : f32
    %657 = vector.broadcast %cst_341 : f32 to vector<8x128xf32>
    %658 = vector.broadcast %cst_342 : f32 to vector<8x128xf32>
    %659 = arith.select %656, %657, %658 : vector<8x128xi1>, vector<8x128xf32>
    %660 = arith.subf %654, %659 : vector<8x128xf32>
    %cst_343 = arith.constant 1.000000e+00 : f32
    %661 = vector.broadcast %cst_343 : f32 to vector<8x128xf32>
    %662 = arith.cmpf ogt, %660, %661 : vector<8x128xf32>
    %cst_344 = arith.constant 1.000000e+00 : f32
    %cst_345 = arith.constant 0.000000e+00 : f32
    %663 = vector.broadcast %cst_344 : f32 to vector<8x128xf32>
    %664 = vector.broadcast %cst_345 : f32 to vector<8x128xf32>
    %665 = arith.select %662, %663, %664 : vector<8x128xi1>, vector<8x128xf32>
    %c56 = arith.constant 56 : index
    %c0_346 = arith.constant 0 : index
    %666 = vector.load %arg11[%c56, %c0_346] : memref<64x128xf32, #tpu.memory_space<vmem>>, vector<8x128xf32>
    tpu.vector_store %arg11[%c56, %c0_346], %665 {strides = array<i32>} : memref<64x128xf32, #tpu.memory_space<vmem>>, vector<8x128xf32>,
    return
  }
}

</mosaic_0001>

<bundles_post_ra>
// kernel: tpu_custom_call.1
= control target key start
LH: loop header
LB: loop body
LE: loop exit
PB: predicated region body
PF: predicated region fallthrough
CT: control target
= control target key end

     0   :  { %16 = vsyncpa [#allocation3], 0  ;;  %s2384_s0 = inlined_call_operand.hbm [shape: f32[64,128], index: 0, kind: input, shape index: {}]   ;;  %s2385_s1 = inlined_call_operand.hbm [shape: f32[128,128], index: 1, kind: input, shape index: {}]   ;;  %s2386_s2 = inlined_call_operand.vmem [shape: f32[1,128], index: 2, kind: input, shape index: {}]   ;;  %s2387_s3 = inlined_call_operand.hbm [shape: f32[128,128], index: 3, kind: input, shape index: {}]   ;;  %s2388_s4 = inlined_call_operand.vmem [shape: f32[1,128], index: 4, kind: input, shape index: {}]   ;;  %s2389_s5 = inlined_call_operand.hbm [shape: f32[128,128], index: 5, kind: input, shape index: {}]   ;;  %s2390_s6 = inlined_call_operand.vmem [shape: f32[1,128], index: 6, kind: input, shape index: {}]   ;;  %s2391_s7 = inlined_call_operand.hbm [shape: f32[128,128], index: 7, kind: input, shape index: {}]   ;;  %s2392_s8 = inlined_call_operand.vmem [shape: f32[1,128], index: 8, kind: input, shape index: {}]   ;;  %s2393_s9 = inlined_call_operand.hbm [shape: f32[128,128], index: 9, kind: input, shape index: {}]   ;;  %s2394_s10 = inlined_call_operand.vmem [shape: f32[1,128], index: 10, kind: input, shape index: {}]   ;;  %s2395_s11 = inlined_call_operand.hbm [shape: f32[64,128], index: 11, kind: output, shape index: {}]  }
   0x1   :  { %17 = vsyncpa [#allocation6], 0 }
   0x2   :  { %18 = vsyncpa [#allocation9], 0 }
   0x3   :  { %19 = vsyncpa [#allocation12], 0 }
   0x4   :  { %20 = vsyncpa [#allocation4], 0  ;;  %s38_s19 = sshll.u32 %s2385_s1, 4  ;;  %s1375_s20 = smov [#allocation5]   ;;  %s39_s19 = int_to_ptr.hbm [resolvable:$true] %s38_s19 }
   0x5   :  { %s40_s21 = sshll.u32 %s1375_s20, 4  ;;  %s68_s24 = sshll.u32 %s2389_s5, 4  ;;  %s41_s21 = int_to_ptr.vmem [resolvable:$true] %s40_s21  ;;  %s69_s24 = int_to_ptr.hbm [resolvable:$true] %s68_s24 }
   0x6   :  { %s1376_s25 = smov 128   ;;  %s1377_s26 = smov 8  }
   0x7   :  { %46 = dma.hbm_to_vmem [thread:$0]  %s39_s19, 2048, %s41_s21, [#allocation6], %s1376_s25, %s1376_s25, %s1377_s26  }
   0x8   :  { %s1378_s27 = smov [#allocation8]   ;;  %s25_s1 = sshll.u32 %s2384_s0, 4  ;;  %s26_s1 = int_to_ptr.hbm [resolvable:$true] %s25_s1 }
   0x9   :  { %s70_s28 = sshll.u32 %s1378_s27, 4  ;;  %s53_s13 = sshll.u32 %s2387_s3, 4  ;;  %s71_s28 = int_to_ptr.vmem [resolvable:$true] %s70_s28  ;;  %s54_s13 = int_to_ptr.hbm [resolvable:$true] %s53_s13 }
   0xa   :  { %76 = dma.hbm_to_vmem [thread:$0]  %s69_s24, 2048, %s71_s28, [#allocation9], %s1376_s25, %s1376_s25, %s1377_s26  }
   0xb   :  { %s1379_s14 = smov [#allocation2]   ;;  %s1380_s16 = smov [#allocation7]  }
   0xc   :  { %s27_s15 = sshll.u32 %s1379_s14, 4  ;;  %s55_s0 = sshll.u32 %s1380_s16, 4  ;;  %s28_s15 = int_to_ptr.vmem [resolvable:$true] %s27_s15  ;;  %s56_s0 = int_to_ptr.vmem [resolvable:$true] %s55_s0 }
   0xd   :  { %33 = dma.hbm_to_vmem [thread:$0]  %s26_s1, 1024, %s28_s15, [#allocation3], %s1376_s25, %s1376_s25, %s1377_s26  }
   0xe   :  { %s83_s19 = sshll.u32 %s2391_s7, 4  ;;  %s98_s21 = sshll.u32 %s2393_s9, 4  ;;  %s84_s19 = int_to_ptr.hbm [resolvable:$true] %s83_s19  ;;  %s99_s21 = int_to_ptr.hbm [resolvable:$true] %s98_s21 }
   0xf   :  { %61 = dma.hbm_to_vmem [thread:$0]  %s54_s13, 2048, %s56_s0, [#allocation6], %s1376_s25, %s1376_s25, %s1377_s26  }
  0x10   :  { %s1381_s22 = smov [#allocation10]   ;;  %s1382_s24 = smov [#allocation11]  }
  0x11   :  { %s85_s23 = sshll.u32 %s1381_s22, 4  ;;  %s100_s7 = sshll.u32 %s1382_s24, 4  ;;  %s86_s23 = int_to_ptr.vmem [resolvable:$true] %s85_s23  ;;  %s101_s7 = int_to_ptr.vmem [resolvable:$true] %s100_s7 }
  0x12   :  { %91 = dma.hbm_to_vmem [thread:$0]  %s84_s19, 2048, %s86_s23, [#allocation9], %s1376_s25, %s1376_s25, %s1377_s26  }
  0x13   :  { %106 = dma.hbm_to_vmem [thread:$0]  %s99_s21, 2048, %s101_s7, [#allocation12], %s1376_s25, %s1376_s25, %s1377_s26  }
  0x14   :  { %1365 = dma.done.wait [#allocation3], 1024  }
  0x15   :  { %1366 = vsyncadd [#allocation3], 4294966272 }
  0x16   :  { %1367 = dma.done.wait [#allocation6], 4096  }
  0x17   :  { %1368 = vsyncadd [#allocation6], 4294963200 }
  0x18   :  { %1369 = dma.done.wait [#allocation9], 4096  }
  0x19   :  { %1370 = vsyncadd [#allocation9], 4294963200 }
  0x1a   :  { %1371 = dma.done.wait [#allocation12], 2048  }
  0x1b   :  { %1372 = vsyncadd [#allocation12], 4294965248  ;;  %v148_v0 = vld [vmem:[#allocation5 + $0x78] sm:$0xff]  ;;  %v147_v1 = vld [vmem:[#allocation5 + $0x70] sm:$0xff]  ;;  %v1383_v43 = vmov 1.0   ;;  %v1384_v48 = vmov 0.0  }
  0x1c   :  { %161 = vmatpush.msra.mxu0 %v148_v0  ;;  %v146_v2 = vld [vmem:[#allocation5 + $0x68] sm:$0xff]  ;;  %v145_v3 = vld [vmem:[#allocation5 + $0x60] sm:$0xff]  ;;  %v144_v4 = vld [vmem:[#allocation5 + $0x58] sm:$0xff]  ;;  %s1133_s14 = sshll.u32 %s2395_s11, 4  ;;  %s1134_s14 = int_to_ptr.hbm [resolvable:$true] %s1133_s14 }
  0x1d   :  { %v143_v5 = vld [vmem:[#allocation5 + $0x50] sm:$0xff]  ;;  %v142_v6 = vld [vmem:[#allocation5 + $0x48] sm:$0xff]  ;;  %v141_v7 = vld [vmem:[#allocation5 + $0x40] sm:$0xff] }
  0x1e   :  { %162 = vmatpush.msra.mxu0 %v147_v1  ;;  %v140_v8 = vld [vmem:[#allocation5 + $0x38] sm:$0xff]  ;;  %v139_v9 = vld [vmem:[#allocation5 + $0x30] sm:$0xff]  ;;  %v138_v10 = vld [vmem:[#allocation5 + $0x28] sm:$0xff] }
  0x1f   :  { %v137_v11 = vld [vmem:[#allocation5 + $0x20] sm:$0xff]  ;;  %v136_v12 = vld [vmem:[#allocation5 + $0x18] sm:$0xff]  ;;  %v135_v13 = vld [vmem:[#allocation5 + $0x10] sm:$0xff] }
  0x20   :  { %163 = vmatpush.msra.mxu0 %v146_v2  ;;  %v134_v14 = vld [vmem:[#allocation5 + $0x8] sm:$0xff]  ;;  %v133_v15 = vld [vmem:[#allocation5] sm:$0xff]  ;;  %v151_v18 = vld [vmem:[#allocation2 + $0x10] sm:$0xff] }
  0x21   :  { %v149_v16 = vld [vmem:[#allocation2] sm:$0xff]  ;;  %v150_v17 = vld [vmem:[#allocation2 + $0x8] sm:$0xff]  ;;  %v152_v19 = vld [vmem:[#allocation2 + $0x18] sm:$0xff] }
  0x22   :  { %164 = vmatpush.msra.mxu0 %v145_v3  ;;  %v1482_v20 = vld [vmem:[#allocation7 + $0x78] sm:$0xff]  ;;  %v1484_v21 = vld [vmem:[#allocation7 + $0x70] sm:$0xff]  ;;  %v1487_v22 = vld [vmem:[#allocation7 + $0x68] sm:$0xff] }
  0x23   :  { %288 = vmatpush.msra.mxu1 %v1482_v20  ;;  %v1490_v23 = vld [vmem:[#allocation7 + $0x60] sm:$0xff]  ;;  %v1493_v25 = vld [vmem:[#allocation7 + $0x58] sm:$0xff]  ;;  %v1496_v26 = vld [vmem:[#allocation7 + $0x50] sm:$0xff] }
  0x24   :  { %165 = vmatpush.msra.mxu0 %v144_v4  ;;  %v153_v24 = vld [vmem:[#allocation2 + $0x20] sm:$0xff]  ;;  %v1499_v27 = vld [vmem:[#allocation7 + $0x48] sm:$0xff]  ;;  %v1505_v30 = vld [vmem:[#allocation7 + $0x38] sm:$0xff] }
  0x25   :  { %289 = vmatpush.msra.mxu1 %v1484_v21  ;;  %v1502_v28 = vld [vmem:[#allocation7 + $0x40] sm:$0xff]  ;;  %v154_v29 = vld [vmem:[#allocation2 + $0x28] sm:$0xff]  ;;  %v1508_v31 = vld [vmem:[#allocation7 + $0x30] sm:$0xff] }
  0x26   :  { %166 = vmatpush.msra.mxu0 %v143_v5  ;;  %v1511_v32 = vld [vmem:[#allocation7 + $0x28] sm:$0xff]  ;;  %v1514_v33 = vld [vmem:[#allocation7 + $0x20] sm:$0xff]  ;;  %v155_v34 = vld [vmem:[#allocation2 + $0x30] sm:$0xff] }
  0x27   :  { %290 = vmatpush.msra.mxu1 %v1487_v22  ;;  %v1517_v35 = vld [vmem:[#allocation7 + $0x18] sm:$0xff]  ;;  %v1520_v36 = vld [vmem:[#allocation7 + $0x10] sm:$0xff]  ;;  %v1524_v38 = vld [vmem:[#allocation7 + $0x8] sm:$0xff] }
  0x28   :  { %167 = vmatpush.msra.mxu0 %v142_v6  ;;  %v156_v37 = vld [vmem:[#allocation2 + $0x38] sm:$0xff]  ;;  %v1527_v39 = vld [vmem:[#allocation7] sm:$0xff]  ;;  %v1559_v0 = vld [vmem:[#allocation8 + $0x70] sm:$0xff] }
  0x29   :  { %291 = vmatpush.msra.mxu1 %v1490_v23  ;;  %v1533_v40 = vld [vmem:[%s2386_s2] ss:$0 sm:$0xff]  ;;  %v1557_v63 = vld [vmem:[#allocation8 + $0x78] sm:$0xff]  ;;  %v1565_v4 = vld [vmem:[#allocation8 + $0x68] sm:$0xff] }
  0x2a   :  { %168 = vmatpush.msra.mxu0 %v141_v7  ;;  %312 = vmatpush.msra.mxu2 %v1557_v63  ;;  %v1568_v6 = vld [vmem:[#allocation8 + $0x60] sm:$0xff] }
  0x2b   :  { %292 = vmatpush.msra.mxu1 %v1493_v25 }
  0x2c   :  { %169 = vmatpush.msra.mxu0 %v140_v8  ;;  %313 = vmatpush.msra.mxu2 %v1559_v0 }
  0x2d   :  { %293 = vmatpush.msra.mxu1 %v1496_v26 }
  0x2e   :  { %170 = vmatpush.msra.mxu0 %v139_v9  ;;  %314 = vmatpush.msra.mxu2 %v1565_v4  ;;  %v1576_v9 = vld [vmem:[#allocation8 + $0x58] sm:$0xff] }
  0x2f   :  { %294 = vmatpush.msra.mxu1 %v1499_v27 }
  0x30   :  { %171 = vmatpush.msra.mxu0 %v138_v10  ;;  %315 = vmatpush.msra.mxu2 %v1568_v6  ;;  %v1579_v10 = vld [vmem:[#allocation8 + $0x50] sm:$0xff] }
  0x31   :  { %295 = vmatpush.msra.mxu1 %v1502_v28 }
  0x32   :  { %172 = vmatpush.msra.mxu0 %v137_v11  ;;  %316 = vmatpush.msra.mxu2 %v1576_v9 }
  0x33   :  { %296 = vmatpush.msra.mxu1 %v1505_v30 }
  0x34   :  { %173 = vmatpush.msra.mxu0 %v136_v12  ;;  %317 = vmatpush.msra.mxu2 %v1579_v10 }
  0x35   :  { %297 = vmatpush.msra.mxu1 %v1508_v31 }
  0x36   :  { %174 = vmatpush.msra.mxu0 %v135_v13 }
  0x37   :  { %298 = vmatpush.msra.mxu1 %v1511_v32 }
  0x38   :  { %175 = vmatpush.msra.mxu0 %v134_v14  ;;  %v1585_v14 = vld [vmem:[#allocation8 + $0x48] sm:$0xff] }
  0x39   :  { %299 = vmatpush.msra.mxu1 %v1514_v33  ;;  %318 = vmatpush.msra.mxu2 %v1585_v14 }
  0x3a   :  { %176 = vmatpush.msra.mxu0 %v133_v15 }
  0x3b   :  { %177 = vmatmul.f32.vlgmr.msra.gmra.mxu0 %v149_v16  ;;  %300 = vmatpush.msra.mxu1 %v1517_v35  ;;  %v1588_v16 = vld [vmem:[#allocation8 + $0x40] sm:$0xff] }
  0x3c   :  { %319 = vmatpush.msra.mxu2 %v1588_v16 }
  0x3d   :  { %301 = vmatpush.msra.mxu1 %v1520_v36 }
  0x3f   :  { %302 = vmatpush.msra.mxu1 %v1524_v38 }
  0x41   :  { %303 = vmatpush.msra.mxu1 %v1527_v39 }
  0x43   :  { %180 = vmatmul.f32.gmra.mxu0 %v150_v17 }
  0x4b   :  { %183 = vmatmul.f32.gmra.mxu0 %v151_v18 }
  0x53   :  { %186 = vmatmul.f32.gmra.mxu0 %v152_v19  ;;  %v1596_v19 = vld [vmem:[#allocation8 + $0x38] sm:$0xff] }
  0x54   :  { %320 = vmatpush.msra.mxu2 %v1596_v19 }
  0x5b   :  { %189 = vmatmul.f32.gmra.mxu0 %v153_v24  ;;  %v1599_v24 = vld [vmem:[#allocation8 + $0x30] sm:$0xff] }
  0x5c   :  { %321 = vmatpush.msra.mxu2 %v1599_v24 }
  0x63   :  { %192 = vmatmul.f32.gmra.mxu0 %v154_v29 }
  0x6b   :  { %195 = vmatmul.f32.gmra.mxu0 %v155_v34 }
  0x73   :  { %198 = vmatmul.f32.gmra.mxu0 %v156_v37 }
  0xb8   :  { %v178_v41 = vpop.f32.mrf.mxu0 }
  0xb9   :  { %v179_v42 = vadd.f32 %v1533_v40, %v178_v41  ;;  %v1605_v41 = vld [vmem:[#allocation8 + $0x28] sm:$0xff] }
  0xba   :  { %322 = vmatpush.msra.mxu2 %v1605_v41 }
  0xbb   :  { %vm286_vm0 = vcmp.gt.f32.partialorder %v179_v42, 1.0  ;;  %v385_v45 = vmul.f32 0.9, %v179_v42 }
  0xbc   :  { %1149 = vmatmul.msk.f32.vlgmr.msra.gmra.mxu1 %vm286_vm0, %v1383_v43  ;;  %v287_v49 = vsel %vm286_vm0, 1.0, %v1384_v48 }
  0xc0   :  { %v181_v44 = vpop.f32.mrf.mxu0 }
  0xc1   :  { %v182_v46 = vadd.f32 %v1533_v40, %v181_v44  ;;  %v1608_v44 = vld [vmem:[#allocation8 + $0x20] sm:$0xff] }
  0xc2   :  { %323 = vmatpush.msra.mxu2 %v1608_v44 }
  0xc3   :  { %v386_v47 = vadd.f32 %v385_v45, %v182_v46 }
  0xc5   :  { %v1539_v50 = vsub.f32 %v386_v47, %v287_v49  ;;  %v1616_v47 = vld [vmem:[#allocation8 + $0x18] sm:$0xff]  ;;  %v1619_v49 = vld [vmem:[#allocation8 + $0x10] sm:$0xff] }
  0xc6   :  { %324 = vmatpush.msra.mxu2 %v1616_v47 }
  0xc7   :  { %vm388_vm1 = vcmp.gt.f32.partialorder %v1539_v50, 1.0  ;;  %v491_v53 = vmul.f32 0.9, %v1539_v50  ;;  %v1699_v50 = vld [vmem:[#allocation10 + $0x78] sm:$0xff] }
  0xc8   :  { %v184_v51 = vpop.f32.mrf.mxu0  ;;  %v389_v55 = vsel %vm388_vm1, 1.0, %v1384_v48  ;;  %325 = vmatpush.msra.mxu2 %v1619_v49  ;;  %336 = vmatpush.msra.mxu3 %v1699_v50 }
  0xc9   :  { %v185_v52 = vadd.f32 %v1533_v40, %v184_v51  ;;  %440 = vmatpush.msrb.mxu0 %v1699_v50 }
  0xcb   :  { %v492_v54 = vadd.f32 %v491_v53, %v185_v52 }
  0xcd   :  { %v1547_v56 = vsub.f32 %v492_v54, %v389_v55  ;;  %v1625_v54 = vld [vmem:[#allocation8 + $0x8] sm:$0xff] }
  0xce   :  { %326 = vmatpush.msra.mxu2 %v1625_v54 }
  0xcf   :  { %vm494_vm2 = vcmp.gt.f32.partialorder %v1547_v56, 1.0  ;;  %v597_v59 = vmul.f32 0.9, %v1547_v56  ;;  %v1704_v56 = vld [vmem:[#allocation10 + $0x70] sm:$0xff] }
  0xd0   :  { %v187_v57 = vpop.f32.mrf.mxu0  ;;  %v495_v61 = vsel %vm494_vm2, 1.0, %v1384_v48  ;;  %337 = vmatpush.msra.mxu3 %v1704_v56  ;;  %441 = vmatpush.msrb.mxu0 %v1704_v56 }
  0xd1   :  { %v188_v58 = vadd.f32 %v1533_v40, %v187_v57  ;;  %v1630_v57 = vld [vmem:[#allocation8] sm:$0xff] }
  0xd2   :  { %327 = vmatpush.msra.mxu2 %v1630_v57 }
  0xd3   :  { %v598_v60 = vadd.f32 %v597_v59, %v188_v58  ;;  %v1660_v59 = vld [vmem:[%s2388_s4] ss:$0 sm:$0xff] }
  0xd4   :  { %390 = vmatpush.msrb.mxu2 %v1482_v20 }
  0xd5   :  { %v1555_v62 = vsub.f32 %v598_v60, %v495_v61 }
  0xd6   :  { %391 = vmatpush.msrb.mxu2 %v1484_v21 }
  0xd7   :  { %vm600_vm3 = vcmp.gt.f32.partialorder %v1555_v62, 1.0  ;;  %v703_v3 = vmul.f32 0.9, %v1555_v62  ;;  %v1756_v62 = vld [vmem:[#allocation10 + $0x20] sm:$0xff] }
  0xd8   :  { %v190_v1 = vpop.f32.mrf.mxu0  ;;  %v601_v7 = vsel %vm600_vm3, 1.0, %v1384_v48  ;;  %392 = vmatpush.msrb.mxu2 %v1487_v22 }
  0xd9   :  { %v191_v2 = vadd.f32 %v1533_v40, %v190_v1  ;;  %v1709_v1 = vld [vmem:[#allocation10 + $0x68] sm:$0xff] }
  0xda   :  { %393 = vmatpush.msrb.mxu2 %v1490_v23  ;;  %338 = vmatpush.msra.mxu3 %v1709_v1 }
  0xdb   :  { %v704_v5 = vadd.f32 %v703_v3, %v191_v2  ;;  %442 = vmatpush.msrb.mxu0 %v1709_v1  ;;  %v1714_v2 = vld [vmem:[#allocation10 + $0x60] sm:$0xff]  ;;  %v1719_v3 = vld [vmem:[#allocation10 + $0x58] sm:$0xff] }
  0xdc   :  { %394 = vmatpush.msrb.mxu2 %v1493_v25  ;;  %339 = vmatpush.msra.mxu3 %v1714_v2 }
  0xdd   :  { %v1574_v8 = vsub.f32 %v704_v5, %v601_v7  ;;  %443 = vmatpush.msrb.mxu0 %v1714_v2  ;;  %v1724_v5 = vld [vmem:[#allocation10 + $0x50] sm:$0xff]  ;;  %v1729_v7 = vld [vmem:[#allocation10 + $0x48] sm:$0xff] }
  0xde   :  { %395 = vmatpush.msrb.mxu2 %v1496_v26  ;;  %340 = vmatpush.msra.mxu3 %v1719_v3 }
  0xdf   :  { %vm706_vm4 = vcmp.gt.f32.partialorder %v1574_v8, 1.0  ;;  %v809_v13 = vmul.f32 0.9, %v1574_v8  ;;  %444 = vmatpush.msrb.mxu0 %v1719_v3  ;;  %v1847_v8 = vld [vmem:[%s2390_s6] ss:$0 sm:$0xff] }
  0xe0   :  { %v193_v11 = vpop.f32.mrf.mxu0  ;;  %v707_v17 = vsel %vm706_vm4, 1.0, %v1384_v48  ;;  %396 = vmatpush.msrb.mxu2 %v1499_v27  ;;  %341 = vmatpush.msra.mxu3 %v1724_v5 }
  0xe1   :  { %v194_v12 = vadd.f32 %v1533_v40, %v193_v11  ;;  %445 = vmatpush.msrb.mxu0 %v1724_v5  ;;  %v1734_v11 = vld [vmem:[#allocation10 + $0x40] sm:$0xff] }
  0xe2   :  { %397 = vmatpush.msrb.mxu2 %v1502_v28  ;;  %342 = vmatpush.msra.mxu3 %v1729_v7 }
  0xe3   :  { %v810_v15 = vadd.f32 %v809_v13, %v194_v12  ;;  %446 = vmatpush.msrb.mxu0 %v1729_v7  ;;  %v1739_v12 = vld [vmem:[#allocation10 + $0x38] sm:$0xff]  ;;  %v1746_v13 = vld [vmem:[#allocation10 + $0x30] sm:$0xff] }
  0xe4   :  { %398 = vmatpush.msrb.mxu2 %v1505_v30  ;;  %343 = vmatpush.msra.mxu3 %v1734_v11 }
  0xe5   :  { %v1594_v18 = vsub.f32 %v810_v15, %v707_v17  ;;  %447 = vmatpush.msrb.mxu0 %v1734_v11  ;;  %v1751_v15 = vld [vmem:[#allocation10 + $0x28] sm:$0xff]  ;;  %v1761_v17 = vld [vmem:[#allocation10 + $0x18] sm:$0xff] }
  0xe6   :  { %399 = vmatpush.msrb.mxu2 %v1508_v31  ;;  %344 = vmatpush.msra.mxu3 %v1739_v12 }
  0xe7   :  { %vm812_vm5 = vcmp.gt.f32.partialorder %v1594_v18, 1.0  ;;  %v915_v37 = vmul.f32 0.9, %v1594_v18  ;;  %448 = vmatpush.msrb.mxu0 %v1739_v12 }
  0xe8   :  { %v196_v29 = vpop.f32.mrf.mxu0  ;;  %v813_v45 = vsel %vm812_vm5, 1.0, %v1384_v48  ;;  %400 = vmatpush.msrb.mxu2 %v1511_v32  ;;  %345 = vmatpush.msra.mxu3 %v1746_v13 }
  0xe9   :  { %v197_v34 = vadd.f32 %v1533_v40, %v196_v29  ;;  %449 = vmatpush.msrb.mxu0 %v1746_v13  ;;  %v1766_v29 = vld [vmem:[#allocation10 + $0x10] sm:$0xff] }
  0xea   :  { %401 = vmatpush.msrb.mxu2 %v1514_v33  ;;  %346 = vmatpush.msra.mxu3 %v1751_v15 }
  0xeb   :  { %v916_v42 = vadd.f32 %v915_v37, %v197_v34  ;;  %450 = vmatpush.msrb.mxu0 %v1751_v15  ;;  %v1771_v34 = vld [vmem:[#allocation10 + $0x8] sm:$0xff]  ;;  %v1776_v37 = vld [vmem:[#allocation10] sm:$0xff] }
  0xec   :  { %402 = vmatpush.msrb.mxu2 %v1517_v35  ;;  %347 = vmatpush.msra.mxu3 %v1756_v62 }
  0xed   :  { %v1614_v46 = vsub.f32 %v916_v42, %v813_v45  ;;  %451 = vmatpush.msrb.mxu0 %v1756_v62 }
  0xee   :  { %403 = vmatpush.msrb.mxu2 %v1520_v36  ;;  %348 = vmatpush.msra.mxu3 %v1761_v17 }
  0xef   :  { %vm918_vm6 = vcmp.gt.f32.partialorder %v1614_v46, 1.0  ;;  %v1021_v53 = vmul.f32 0.9, %v1614_v46  ;;  %452 = vmatpush.msrb.mxu0 %v1761_v17 }
  0xf0   :  { %v199_v51 = vpop.f32.mrf.mxu0  ;;  %v1635_v58 = vsel %vm918_vm6, 1.0, %v1384_v48  ;;  %404 = vmatpush.msrb.mxu2 %v1524_v38  ;;  %349 = vmatpush.msra.mxu3 %v1766_v29 }
  0xf1   :  { %v200_v52 = vadd.f32 %v1533_v40, %v199_v51  ;;  %453 = vmatpush.msrb.mxu0 %v1766_v29 }
  0xf2   :  { %405 = vmatpush.msrb.mxu2 %v1527_v39  ;;  %350 = vmatpush.msra.mxu3 %v1771_v34 }
  0xf3   :  { %v1628_v55 = vadd.f32 %v1021_v53, %v200_v52  ;;  %454 = vmatpush.msrb.mxu0 %v1771_v34 }
  0xf4   :  { %351 = vmatpush.msra.mxu3 %v1776_v37 }
  0xf5   :  { %v1023_v40 = vsub.f32 %v1628_v55, %v1635_v58  ;;  %455 = vmatpush.msrb.mxu0 %v1776_v37 }
  0xf6   :  { %415 = vmatpush.msrb.mxu3 %v1557_v63 }
  0xf7   :  { %546 = vmatpush.msra.mxu0 %v1699_v50  ;;  %vm1024_vm11 = vcmp.gt.f32.partialorder %v1023_v40, 1.0 }
  0xf8   :  { %416 = vmatpush.msrb.mxu3 %v1559_v0 }
  0xf9   :  { %547 = vmatpush.msra.mxu0 %v1704_v56 }
  0xfa   :  { %417 = vmatpush.msrb.mxu3 %v1565_v4 }
  0xfb   :  { %548 = vmatpush.msra.mxu0 %v1709_v1 }
  0xfc   :  { %418 = vmatpush.msrb.mxu3 %v1568_v6 }
  0xfd   :  { %549 = vmatpush.msra.mxu0 %v1714_v2 }
  0xfe   :  { %419 = vmatpush.msrb.mxu3 %v1576_v9 }
  0xff   :  { %550 = vmatpush.msra.mxu0 %v1719_v3 }
 0x100   :  { %420 = vmatpush.msrb.mxu3 %v1579_v10 }
 0x101   :  { %551 = vmatpush.msra.mxu0 %v1724_v5 }
 0x102   :  { %421 = vmatpush.msrb.mxu3 %v1585_v14 }
 0x103   :  { %552 = vmatpush.msra.mxu0 %v1729_v7 }
 0x104   :  { %422 = vmatpush.msrb.mxu3 %v1588_v16 }
 0x105   :  { %553 = vmatpush.msra.mxu0 %v1734_v11 }
 0x106   :  { %423 = vmatpush.msrb.mxu3 %v1596_v19 }
 0x107   :  { %554 = vmatpush.msra.mxu0 %v1739_v12 }
 0x108   :  { %424 = vmatpush.msrb.mxu3 %v1599_v24 }
 0x109   :  { %555 = vmatpush.msra.mxu0 %v1746_v13 }
 0x10a   :  { %425 = vmatpush.msrb.mxu3 %v1605_v41 }
 0x10b   :  { %556 = vmatpush.msra.mxu0 %v1751_v15 }
 0x10c   :  { %426 = vmatpush.msrb.mxu3 %v1608_v44 }
 0x10d   :  { %557 = vmatpush.msra.mxu0 %v1756_v62 }
 0x10e   :  { %427 = vmatpush.msrb.mxu3 %v1616_v47 }
 0x10f   :  { %558 = vmatpush.msra.mxu0 %v1761_v17 }
 0x110   :  { %428 = vmatpush.msrb.mxu3 %v1619_v49 }
 0x111   :  { %559 = vmatpush.msra.mxu0 %v1766_v29 }
 0x112   :  { %429 = vmatpush.msrb.mxu3 %v1625_v54 }
 0x113   :  { %560 = vmatpush.msra.mxu0 %v1771_v34 }
 0x114   :  { %430 = vmatpush.msrb.mxu3 %v1630_v57 }
 0x115   :  { %561 = vmatpush.msra.mxu0 %v1776_v37 }
 0x139   :  { %v305_v60 = vpop.f32.mrf.mxu1 }
 0x13a   :  { %v1663_v61 = vadd.f32 %v1660_v59, %v305_v60 }
 0x13c   :  { %vm310_vm7 = vcmp.gt.f32.partialorder %v1663_v61, 1.0  ;;  %v410_v51 = vmul.f32 0.9, %v1663_v61 }
 0x13d   :  { %1150 = vmatmul.msk.f32.vlgmr.msra.gmra.mxu2 %vm310_vm7, %v1383_v43  ;;  %v311_v60 = vsel %vm310_vm7, 1.0, %v1384_v48 }
 0x13e   :  { %496 = vmatpush.msra.mxu2 %v1482_v20 }
 0x140   :  { %497 = vmatpush.msra.mxu2 %v1484_v21 }
 0x142   :  { %498 = vmatpush.msra.mxu2 %v1487_v22 }
 0x144   :  { %499 = vmatpush.msra.mxu2 %v1490_v23 }
 0x145   :  { %1153 = vmatmul.msk.f32.vlgmr.msrb.gmra.mxu2 %vm388_vm1, %v1383_v43 }
 0x146   :  { %500 = vmatpush.msra.mxu2 %v1493_v25 }
 0x148   :  { %501 = vmatpush.msra.mxu2 %v1496_v26 }
 0x14a   :  { %502 = vmatpush.msra.mxu2 %v1499_v27 }
 0x14c   :  { %503 = vmatpush.msra.mxu2 %v1502_v28 }
 0x14e   :  { %504 = vmatpush.msra.mxu2 %v1505_v30 }
 0x150   :  { %505 = vmatpush.msra.mxu2 %v1508_v31 }
 0x152   :  { %506 = vmatpush.msra.mxu2 %v1511_v32 }
 0x154   :  { %507 = vmatpush.msra.mxu2 %v1514_v33 }
 0x156   :  { %508 = vmatpush.msra.mxu2 %v1517_v35 }
 0x158   :  { %509 = vmatpush.msra.mxu2 %v1520_v36 }
 0x15a   :  { %510 = vmatpush.msra.mxu2 %v1524_v38 }
 0x15c   :  { %511 = vmatpush.msra.mxu2 %v1527_v39 }
 0x15d   :  { %1157 = vmatmul.msk.f32.vlgmr.msra.gmra.mxu2 %vm494_vm2, %v1383_v43 }
 0x15e   :  { %602 = vmatpush.msrb.mxu2 %v1482_v20 }
 0x160   :  { %603 = vmatpush.msrb.mxu2 %v1484_v21 }
 0x162   :  { %604 = vmatpush.msrb.mxu2 %v1487_v22 }
 0x164   :  { %605 = vmatpush.msrb.mxu2 %v1490_v23 }
 0x166   :  { %606 = vmatpush.msrb.mxu2 %v1493_v25 }
 0x168   :  { %607 = vmatpush.msrb.mxu2 %v1496_v26 }
 0x16a   :  { %608 = vmatpush.msrb.mxu2 %v1499_v27 }
 0x16c   :  { %609 = vmatpush.msrb.mxu2 %v1502_v28 }
 0x16e   :  { %610 = vmatpush.msrb.mxu2 %v1505_v30 }
 0x170   :  { %611 = vmatpush.msrb.mxu2 %v1508_v31 }
 0x172   :  { %612 = vmatpush.msrb.mxu2 %v1511_v32 }
 0x174   :  { %613 = vmatpush.msrb.mxu2 %v1514_v33 }
 0x176   :  { %614 = vmatpush.msrb.mxu2 %v1517_v35 }
 0x178   :  { %615 = vmatpush.msrb.mxu2 %v1520_v36 }
 0x17a   :  { %616 = vmatpush.msrb.mxu2 %v1524_v38 }
 0x17c   :  { %617 = vmatpush.msrb.mxu2 %v1527_v39 }
 0x17d   :  { %1161 = vmatmul.msk.f32.vlgmr.msrb.gmra.mxu2 %vm600_vm3, %v1383_v43 }
 0x17e   :  { %708 = vmatpush.msra.mxu2 %v1482_v20 }
 0x180   :  { %709 = vmatpush.msra.mxu2 %v1484_v21 }
 0x182   :  { %710 = vmatpush.msra.mxu2 %v1487_v22 }
 0x184   :  { %711 = vmatpush.msra.mxu2 %v1490_v23 }
 0x186   :  { %712 = vmatpush.msra.mxu2 %v1493_v25 }
 0x188   :  { %713 = vmatpush.msra.mxu2 %v1496_v26 }
 0x18a   :  { %714 = vmatpush.msra.mxu2 %v1499_v27 }
 0x18c   :  { %715 = vmatpush.msra.mxu2 %v1502_v28 }
 0x18e   :  { %716 = vmatpush.msra.mxu2 %v1505_v30 }
 0x190   :  { %717 = vmatpush.msra.mxu2 %v1508_v31 }
 0x192   :  { %718 = vmatpush.msra.mxu2 %v1511_v32 }
 0x194   :  { %719 = vmatpush.msra.mxu2 %v1514_v33 }
 0x196   :  { %720 = vmatpush.msra.mxu2 %v1517_v35 }
 0x198   :  { %721 = vmatpush.msra.mxu2 %v1520_v36 }
 0x19a   :  { %722 = vmatpush.msra.mxu2 %v1524_v38 }
 0x19c   :  { %723 = vmatpush.msra.mxu2 %v1527_v39 }
 0x19d   :  { %1165 = vmatmul.msk.f32.vlgmr.msra.gmra.mxu2 %vm706_vm4, %v1383_v43 }
 0x19e   :  { %814 = vmatpush.msrb.mxu2 %v1482_v20 }
 0x1a0   :  { %815 = vmatpush.msrb.mxu2 %v1484_v21 }
 0x1a2   :  { %816 = vmatpush.msrb.mxu2 %v1487_v22 }
 0x1a4   :  { %817 = vmatpush.msrb.mxu2 %v1490_v23 }
 0x1a6   :  { %818 = vmatpush.msrb.mxu2 %v1493_v25 }
 0x1a8   :  { %819 = vmatpush.msrb.mxu2 %v1496_v26 }
 0x1aa   :  { %820 = vmatpush.msrb.mxu2 %v1499_v27 }
 0x1ac   :  { %821 = vmatpush.msrb.mxu2 %v1502_v28 }
 0x1ae   :  { %822 = vmatpush.msrb.mxu2 %v1505_v30 }
 0x1b0   :  { %823 = vmatpush.msrb.mxu2 %v1508_v31 }
 0x1b2   :  { %824 = vmatpush.msrb.mxu2 %v1511_v32 }
 0x1b4   :  { %825 = vmatpush.msrb.mxu2 %v1514_v33 }
 0x1b6   :  { %826 = vmatpush.msrb.mxu2 %v1517_v35 }
 0x1b8   :  { %827 = vmatpush.msrb.mxu2 %v1520_v36 }
 0x1ba   :  { %828 = vmatpush.msrb.mxu2 %v1524_v38 }
 0x1bc   :  { %829 = vmatpush.msrb.mxu2 %v1527_v39 }
 0x1bd   :  { %1169 = vmatmul.msk.f32.vlgmr.msrb.gmra.mxu2 %vm812_vm5, %v1383_v43 }
 0x1be   :  { %920 = vmatpush.msra.mxu2 %v1482_v20 }
 0x1c0   :  { %921 = vmatpush.msra.mxu2 %v1484_v21  ;;  %v329_v42 = vpop.f32.mrf.mxu2 }
 0x1c1   :  { %v1852_v45 = vadd.f32 %v1847_v8, %v329_v42 }
 0x1c2   :  { %922 = vmatpush.msra.mxu2 %v1487_v22 }
 0x1c3   :  { %vm334_vm8 = vcmp.gt.f32.partialorder %v1852_v45, 1.0 }
 0x1c4   :  { %923 = vmatpush.msra.mxu2 %v1490_v23  ;;  %1151 = vmatmul.msk.f32.vlgmr.msra.gmra.mxu3 %vm334_vm8, %v1383_v43 }
 0x1c5   :  { %521 = vmatpush.msra.mxu3 %v1557_v63 }
 0x1c6   :  { %924 = vmatpush.msra.mxu2 %v1493_v25 }
 0x1c7   :  { %522 = vmatpush.msra.mxu3 %v1559_v0 }
 0x1c8   :  { %925 = vmatpush.msra.mxu2 %v1496_v26  ;;  %v407_v18 = vpop.f32.mrf.mxu2 }
 0x1c9   :  { %v408_v52 = vadd.f32 %v1660_v59, %v407_v18  ;;  %523 = vmatpush.msra.mxu3 %v1565_v4 }
 0x1ca   :  { %926 = vmatpush.msra.mxu2 %v1499_v27 }
 0x1cb   :  { %v411_v53 = vadd.f32 %v410_v51, %v408_v52  ;;  %524 = vmatpush.msra.mxu3 %v1568_v6 }
 0x1cc   :  { %927 = vmatpush.msra.mxu2 %v1502_v28 }
 0x1cd   :  { %v412_v42 = vsub.f32 %v411_v53, %v311_v60  ;;  %525 = vmatpush.msra.mxu3 %v1576_v9  ;;  %v1988_v60 = vld [vmem:[#allocation11 + $0x30] sm:$0xff] }
 0x1ce   :  { %928 = vmatpush.msra.mxu2 %v1505_v30 }
 0x1cf   :  { %vm413_vm9 = vcmp.gt.f32.partialorder %v412_v42, 1.0  ;;  %526 = vmatpush.msra.mxu3 %v1579_v10  ;;  %v516_v51 = vmul.f32 0.9, %v412_v42 }
 0x1d0   :  { %929 = vmatpush.msra.mxu2 %v1508_v31  ;;  %1154 = vmatmul.msk.f32.vlgmr.msrb.gmra.mxu3 %vm413_vm9, %v1383_v43  ;;  %v414_v46 = vsel %vm413_vm9, 1.0, %v1384_v48 }
 0x1d1   :  { %527 = vmatpush.msra.mxu3 %v1585_v14 }
 0x1d2   :  { %930 = vmatpush.msra.mxu2 %v1511_v32 }
 0x1d3   :  { %528 = vmatpush.msra.mxu3 %v1588_v16 }
 0x1d4   :  { %931 = vmatpush.msra.mxu2 %v1514_v33 }
 0x1d5   :  { %529 = vmatpush.msra.mxu3 %v1596_v19 }
 0x1d6   :  { %932 = vmatpush.msra.mxu2 %v1517_v35 }
 0x1d7   :  { %530 = vmatpush.msra.mxu3 %v1599_v24 }
 0x1d8   :  { %933 = vmatpush.msra.mxu2 %v1520_v36 }
 0x1d9   :  { %531 = vmatpush.msra.mxu3 %v1605_v41 }
 0x1da   :  { %934 = vmatpush.msra.mxu2 %v1524_v38 }
 0x1db   :  { %532 = vmatpush.msra.mxu3 %v1608_v44 }
 0x1dc   :  { %935 = vmatpush.msra.mxu2 %v1527_v39 }
 0x1dd   :  { %1173 = vmatmul.msk.f32.vlgmr.msra.gmra.mxu2 %vm918_vm6, %v1383_v43  ;;  %533 = vmatpush.msra.mxu3 %v1616_v47 }
 0x1de   :  { %1026 = vmatpush.msrb.mxu2 %v1482_v20 }
 0x1df   :  { %534 = vmatpush.msra.mxu3 %v1619_v49 }
 0x1e0   :  { %1027 = vmatpush.msrb.mxu2 %v1484_v21  ;;  %v513_v61 = vpop.f32.mrf.mxu2 }
 0x1e1   :  { %v514_v18 = vadd.f32 %v1660_v59, %v513_v61  ;;  %535 = vmatpush.msra.mxu3 %v1625_v54 }
 0x1e2   :  { %1028 = vmatpush.msrb.mxu2 %v1487_v22 }
 0x1e3   :  { %v517_v52 = vadd.f32 %v516_v51, %v514_v18  ;;  %536 = vmatpush.msra.mxu3 %v1630_v57  ;;  %v1994_v18 = vld [vmem:[#allocation11 + $0x28] sm:$0xff]  ;;  %v1996_v51 = vld [vmem:[#allocation11 + $0x20] sm:$0xff] }
 0x1e4   :  { %1029 = vmatpush.msrb.mxu2 %v1490_v23 }
 0x1e5   :  { %627 = vmatpush.msrb.mxu3 %v1557_v63  ;;  %v518_v20 = vsub.f32 %v517_v52, %v414_v46  ;;  %v2000_v52 = vld [vmem:[#allocation11 + $0x18] sm:$0xff]  ;;  %v2006_v46 = vld [vmem:[#allocation11 + $0x10] sm:$0xff] }
 0x1e6   :  { %1030 = vmatpush.msrb.mxu2 %v1493_v25 }
 0x1e7   :  { %628 = vmatpush.msrb.mxu3 %v1559_v0  ;;  %vm519_vm10 = vcmp.gt.f32.partialorder %v518_v20, 1.0  ;;  %v622_v23 = vmul.f32 0.9, %v518_v20  ;;  %v2010_v20 = vld [vmem:[#allocation11 + $0x8] sm:$0xff] }
 0x1e8   :  { %1031 = vmatpush.msrb.mxu2 %v1496_v26  ;;  %1158 = vmatmul.msk.f32.vlgmr.msra.gmra.mxu3 %vm519_vm10, %v1383_v43  ;;  %v520_v26 = vsel %vm519_vm10, 1.0, %v1384_v48 }
 0x1e9   :  { %629 = vmatpush.msrb.mxu3 %v1565_v4 }
 0x1ea   :  { %1032 = vmatpush.msrb.mxu2 %v1499_v27 }
 0x1eb   :  { %630 = vmatpush.msrb.mxu3 %v1568_v6 }
 0x1ec   :  { %1033 = vmatpush.msrb.mxu2 %v1502_v28  ;;  %v1948_v28 = vld [vmem:[#allocation11 + $0x78] sm:$0xff] }
 0x1ed   :  { %631 = vmatpush.msrb.mxu3 %v1576_v9  ;;  %360 = vmatpush.msrb.mxu1 %v1948_v28 }
 0x1ee   :  { %1034 = vmatpush.msrb.mxu2 %v1505_v30  ;;  %v1952_v30 = vld [vmem:[#allocation11 + $0x70] sm:$0xff] }
 0x1ef   :  { %632 = vmatpush.msrb.mxu3 %v1579_v10  ;;  %361 = vmatpush.msrb.mxu1 %v1952_v30 }
 0x1f0   :  { %1035 = vmatpush.msrb.mxu2 %v1508_v31  ;;  %v1956_v31 = vld [vmem:[#allocation11 + $0x68] sm:$0xff] }
 0x1f1   :  { %633 = vmatpush.msrb.mxu3 %v1585_v14  ;;  %362 = vmatpush.msrb.mxu1 %v1956_v31 }
 0x1f2   :  { %1036 = vmatpush.msrb.mxu2 %v1511_v32  ;;  %v1960_v32 = vld [vmem:[#allocation11 + $0x60] sm:$0xff] }
 0x1f3   :  { %634 = vmatpush.msrb.mxu3 %v1588_v16  ;;  %363 = vmatpush.msrb.mxu1 %v1960_v32 }
 0x1f4   :  { %1037 = vmatpush.msrb.mxu2 %v1514_v33  ;;  %v1964_v33 = vld [vmem:[#allocation11 + $0x58] sm:$0xff] }
 0x1f5   :  { %635 = vmatpush.msrb.mxu3 %v1596_v19  ;;  %364 = vmatpush.msrb.mxu1 %v1964_v33 }
 0x1f6   :  { %1038 = vmatpush.msrb.mxu2 %v1517_v35  ;;  %v1968_v35 = vld [vmem:[#allocation11 + $0x50] sm:$0xff] }
 0x1f7   :  { %636 = vmatpush.msrb.mxu3 %v1599_v24  ;;  %365 = vmatpush.msrb.mxu1 %v1968_v35 }
 0x1f8   :  { %1039 = vmatpush.msrb.mxu2 %v1520_v36  ;;  %v1972_v36 = vld [vmem:[#allocation11 + $0x48] sm:$0xff] }
 0x1f9   :  { %637 = vmatpush.msrb.mxu3 %v1605_v41  ;;  %366 = vmatpush.msrb.mxu1 %v1972_v36 }
 0x1fa   :  { %1040 = vmatpush.msrb.mxu2 %v1524_v38  ;;  %v1976_v38 = vld [vmem:[#allocation11 + $0x40] sm:$0xff] }
 0x1fb   :  { %638 = vmatpush.msrb.mxu3 %v1608_v44  ;;  %367 = vmatpush.msrb.mxu1 %v1976_v38 }
 0x1fc   :  { %1041 = vmatpush.msrb.mxu2 %v1527_v39  ;;  %v1980_v39 = vld [vmem:[#allocation11 + $0x38] sm:$0xff] }
 0x1fd   :  { %1177 = vmatmul.msk.f32.vlgmr.msrb.gmra.mxu2 %vm1024_vm11, %v1383_v43  ;;  %639 = vmatpush.msrb.mxu3 %v1616_v47 }
 0x1fe   :  { %368 = vmatpush.msrb.mxu1 %v1980_v39 }
 0x1ff   :  { %640 = vmatpush.msrb.mxu3 %v1619_v49 }
 0x200   :  { %v619_v21 = vpop.f32.mrf.mxu2  ;;  %369 = vmatpush.msrb.mxu1 %v1988_v60 }
 0x201   :  { %v620_v22 = vadd.f32 %v1660_v59, %v619_v21  ;;  %641 = vmatpush.msrb.mxu3 %v1625_v54  ;;  %v2014_v21 = vld [vmem:[#allocation11] sm:$0xff] }
 0x202   :  { %370 = vmatpush.msrb.mxu1 %v1994_v18 }
 0x203   :  { %v623_v25 = vadd.f32 %v622_v23, %v620_v22  ;;  %642 = vmatpush.msrb.mxu3 %v1630_v57 }
 0x204   :  { %371 = vmatpush.msrb.mxu1 %v1996_v51 }
 0x205   :  { %733 = vmatpush.msra.mxu3 %v1557_v63  ;;  %v624_v27 = vsub.f32 %v623_v25, %v520_v26 }
 0x206   :  { %372 = vmatpush.msrb.mxu1 %v2000_v52 }
 0x207   :  { %734 = vmatpush.msra.mxu3 %v1559_v0  ;;  %vm625_vm12 = vcmp.gt.f32.partialorder %v624_v27, 1.0  ;;  %v728_v40 = vmul.f32 0.9, %v624_v27 }
 0x208   :  { %1162 = vmatmul.msk.f32.vlgmr.msrb.gmra.mxu3 %vm625_vm12, %v1383_v43  ;;  %v626_v42 = vsel %vm625_vm12, 1.0, %v1384_v48  ;;  %373 = vmatpush.msrb.mxu1 %v2006_v46 }
 0x209   :  { %735 = vmatpush.msra.mxu3 %v1565_v4 }
 0x20a   :  { %374 = vmatpush.msrb.mxu1 %v2010_v20 }
 0x20b   :  { %736 = vmatpush.msra.mxu3 %v1568_v6 }
 0x20c   :  { %375 = vmatpush.msrb.mxu1 %v2014_v21 }
 0x20d   :  { %737 = vmatpush.msra.mxu3 %v1576_v9 }
 0x20e   :  { %465 = vmatpush.msra.mxu1 %v1948_v28 }
 0x20f   :  { %738 = vmatpush.msra.mxu3 %v1579_v10 }
 0x210   :  { %466 = vmatpush.msra.mxu1 %v1952_v30 }
 0x211   :  { %739 = vmatpush.msra.mxu3 %v1585_v14 }
 0x212   :  { %467 = vmatpush.msra.mxu1 %v1956_v31 }
 0x213   :  { %740 = vmatpush.msra.mxu3 %v1588_v16 }
 0x214   :  { %468 = vmatpush.msra.mxu1 %v1960_v32 }
 0x215   :  { %741 = vmatpush.msra.mxu3 %v1596_v19 }
 0x216   :  { %469 = vmatpush.msra.mxu1 %v1964_v33 }
 0x217   :  { %742 = vmatpush.msra.mxu3 %v1599_v24 }
 0x218   :  { %470 = vmatpush.msra.mxu1 %v1968_v35 }
 0x219   :  { %743 = vmatpush.msra.mxu3 %v1605_v41 }
 0x21a   :  { %471 = vmatpush.msra.mxu1 %v1972_v36 }
 0x21b   :  { %744 = vmatpush.msra.mxu3 %v1608_v44 }
 0x21c   :  { %472 = vmatpush.msra.mxu1 %v1976_v38 }
 0x21d   :  { %745 = vmatpush.msra.mxu3 %v1616_v47 }
 0x21e   :  { %473 = vmatpush.msra.mxu1 %v1980_v39 }
 0x21f   :  { %746 = vmatpush.msra.mxu3 %v1619_v49 }
 0x220   :  { %v725_v55 = vpop.f32.mrf.mxu2  ;;  %474 = vmatpush.msra.mxu1 %v1988_v60 }
 0x221   :  { %v726_v58 = vadd.f32 %v1660_v59, %v725_v55  ;;  %747 = vmatpush.msra.mxu3 %v1625_v54  ;;  %v2046_v55 = vld [vmem:[%s2392_s8] ss:$0 sm:$0xff] }
 0x222   :  { %475 = vmatpush.msra.mxu1 %v1994_v18 }
 0x223   :  { %v729_v53 = vadd.f32 %v728_v40, %v726_v58  ;;  %748 = vmatpush.msra.mxu3 %v1630_v57 }
 0x224   :  { %476 = vmatpush.msra.mxu1 %v1996_v51 }
 0x225   :  { %839 = vmatpush.msrb.mxu3 %v1557_v63  ;;  %v730_v61 = vsub.f32 %v729_v53, %v626_v42 }
 0x226   :  { %477 = vmatpush.msra.mxu1 %v2000_v52 }
 0x227   :  { %840 = vmatpush.msrb.mxu3 %v1559_v0  ;;  %vm731_vm13 = vcmp.gt.f32.partialorder %v730_v61, 1.0  ;;  %v834_v25 = vmul.f32 0.9, %v730_v61  ;;  %v435_v61 = vmul.f32 0.9, %v1852_v45 }
 0x228   :  { %1166 = vmatmul.msk.f32.vlgmr.msra.gmra.mxu3 %vm731_vm13, %v1383_v43  ;;  %v732_v27 = vsel %vm731_vm13, 1.0, %v1384_v48  ;;  %478 = vmatpush.msra.mxu1 %v2006_v46 }
 0x229   :  { %841 = vmatpush.msrb.mxu3 %v1565_v4 }
 0x22a   :  { %479 = vmatpush.msra.mxu1 %v2010_v20 }
 0x22b   :  { %842 = vmatpush.msrb.mxu3 %v1568_v6 }
 0x22c   :  { %480 = vmatpush.msra.mxu1 %v2014_v21 }
 0x22d   :  { %843 = vmatpush.msrb.mxu3 %v1576_v9 }
 0x22f   :  { %844 = vmatpush.msrb.mxu3 %v1579_v10 }
 0x231   :  { %845 = vmatpush.msrb.mxu3 %v1585_v14 }
 0x233   :  { %846 = vmatpush.msrb.mxu3 %v1588_v16 }
 0x235   :  { %847 = vmatpush.msrb.mxu3 %v1596_v19 }
 0x237   :  { %848 = vmatpush.msrb.mxu3 %v1599_v24 }
 0x239   :  { %849 = vmatpush.msrb.mxu3 %v1605_v41 }
 0x23b   :  { %850 = vmatpush.msrb.mxu3 %v1608_v44 }
 0x23d   :  { %851 = vmatpush.msrb.mxu3 %v1616_v47 }
 0x23f   :  { %852 = vmatpush.msrb.mxu3 %v1619_v49 }
 0x240   :  { %v831_v22 = vpop.f32.mrf.mxu2 }
 0x241   :  { %v832_v23 = vadd.f32 %v1660_v59, %v831_v22  ;;  %853 = vmatpush.msrb.mxu3 %v1625_v54 }
 0x243   :  { %v835_v26 = vadd.f32 %v834_v25, %v832_v23  ;;  %854 = vmatpush.msrb.mxu3 %v1630_v57  ;;  %v335_v25 = vsel %vm334_vm8, 1.0, %v1384_v48 }
 0x245   :  { %945 = vmatpush.msra.mxu3 %v1557_v63  ;;  %v836_v58 = vsub.f32 %v835_v26, %v732_v27 }
 0x247   :  { %946 = vmatpush.msra.mxu3 %v1559_v0  ;;  %vm837_vm14 = vcmp.gt.f32.partialorder %v836_v58, 1.0  ;;  %v353_v40 = vpop.f32.mrf.mxu3 }
 0x248   :  { %1170 = vmatmul.msk.f32.vlgmr.msrb.gmra.mxu3 %vm837_vm14, %v1383_v43  ;;  %v2054_v53 = vadd.f32 %v2046_v55, %v353_v40  ;;  %v940_v40 = vmul.f32 0.9, %v836_v58 }
 0x249   :  { %947 = vmatpush.msra.mxu3 %v1565_v4 }
 0x24a   :  { %vm358_vm15 = vcmp.gt.f32.partialorder %v2054_v53, 1.0 }
 0x24b   :  { %948 = vmatpush.msra.mxu3 %v1568_v6  ;;  %1152 = vmatmul.msk.f32.vlgmr.msrb.gmra.mxu1 %vm358_vm15, %v1383_v43 }
 0x24c   :  { %571 = vmatpush.msrb.mxu1 %v1948_v28 }
 0x24d   :  { %949 = vmatpush.msra.mxu3 %v1576_v9 }
 0x24e   :  { %572 = vmatpush.msrb.mxu1 %v1952_v30 }
 0x24f   :  { %950 = vmatpush.msra.mxu3 %v1579_v10 }
 0x250   :  { %573 = vmatpush.msrb.mxu1 %v1956_v31 }
 0x251   :  { %951 = vmatpush.msra.mxu3 %v1585_v14 }
 0x252   :  { %574 = vmatpush.msrb.mxu1 %v1960_v32 }
 0x253   :  { %952 = vmatpush.msra.mxu3 %v1588_v16  ;;  %v432_v42 = vpop.f32.mrf.mxu3 }
 0x254   :  { %v433_v22 = vadd.f32 %v1847_v8, %v432_v42  ;;  %575 = vmatpush.msrb.mxu1 %v1964_v33 }
 0x255   :  { %953 = vmatpush.msra.mxu3 %v1596_v19 }
 0x256   :  { %v436_v23 = vadd.f32 %v435_v61, %v433_v22  ;;  %576 = vmatpush.msrb.mxu1 %v1968_v35  ;;  %v838_v61 = vsel %vm837_vm14, 1.0, %v1384_v48 }
 0x257   :  { %954 = vmatpush.msra.mxu3 %v1599_v24 }
 0x258   :  { %v437_v26 = vsub.f32 %v436_v23, %v335_v25  ;;  %577 = vmatpush.msrb.mxu1 %v1972_v36 }
 0x259   :  { %955 = vmatpush.msra.mxu3 %v1605_v41 }
 0x25a   :  { %vm438_vm0 = vcmp.gt.f32.partialorder %v437_v26, 1.0  ;;  %578 = vmatpush.msrb.mxu1 %v1976_v38  ;;  %v541_v58 = vmul.f32 0.9, %v437_v26 }
 0x25b   :  { %956 = vmatpush.msra.mxu3 %v1608_v44  ;;  %1155 = vmatmul.msk.f32.vlgmr.msrb.gmra.mxu0 %vm438_vm0, %v1383_v43 }
 0x25c   :  { %652 = vmatpush.msrb.mxu0 %v1699_v50  ;;  %579 = vmatpush.msrb.mxu1 %v1980_v39 }
 0x25d   :  { %957 = vmatpush.msra.mxu3 %v1616_v47 }
 0x25e   :  { %653 = vmatpush.msrb.mxu0 %v1704_v56  ;;  %580 = vmatpush.msrb.mxu1 %v1988_v60 }
 0x25f   :  { %958 = vmatpush.msra.mxu3 %v1619_v49 }
 0x260   :  { %v937_v45 = vpop.f32.mrf.mxu2  ;;  %654 = vmatpush.msrb.mxu0 %v1709_v1  ;;  %581 = vmatpush.msrb.mxu1 %v1994_v18 }
 0x261   :  { %v938_v27 = vadd.f32 %v1660_v59, %v937_v45  ;;  %959 = vmatpush.msra.mxu3 %v1625_v54 }
 0x262   :  { %655 = vmatpush.msrb.mxu0 %v1714_v2  ;;  %582 = vmatpush.msrb.mxu1 %v1996_v51 }
 0x263   :  { %v941_v42 = vadd.f32 %v940_v40, %v938_v27  ;;  %960 = vmatpush.msra.mxu3 %v1630_v57 }
 0x264   :  { %656 = vmatpush.msrb.mxu0 %v1719_v3  ;;  %583 = vmatpush.msrb.mxu1 %v2000_v52 }
 0x265   :  { %1051 = vmatpush.msrb.mxu3 %v1557_v63  ;;  %v942_v22 = vsub.f32 %v941_v42, %v838_v61  ;;  %v2197_v42 = vld [vmem:[%s2394_s10] ss:$0 sm:$0xff]  ;;  %s1385_s10 = smov [#allocation13]  }
 0x266   :  { %657 = vmatpush.msrb.mxu0 %v1724_v5  ;;  %584 = vmatpush.msrb.mxu1 %v2006_v46  ;;  %s1131_s5 = sshll.u32 %s1385_s10, 4  ;;  %s1132_s5 = int_to_ptr.vmem [resolvable:$true] %s1131_s5 }
 0x267   :  { %1052 = vmatpush.msrb.mxu3 %v1559_v0  ;;  %vm943_vm1 = vcmp.gt.f32.partialorder %v942_v22, 1.0 }
 0x268   :  { %1174 = vmatmul.msk.f32.vlgmr.msra.gmra.mxu3 %vm943_vm1, %v1383_v43  ;;  %658 = vmatpush.msrb.mxu0 %v1729_v7 }
 0x269   :  { %1053 = vmatpush.msrb.mxu3 %v1565_v4  ;;  %v439_v4 = vsel %vm438_vm0, 1.0, %v1384_v48  ;;  %585 = vmatpush.msrb.mxu1 %v2010_v20 }
 0x26a   :  { %659 = vmatpush.msrb.mxu0 %v1734_v11 }
 0x26b   :  { %1054 = vmatpush.msrb.mxu3 %v1568_v6  ;;  %v538_v63 = vpop.f32.mrf.mxu3  ;;  %586 = vmatpush.msrb.mxu1 %v2014_v21 }
 0x26c   :  { %v539_v0 = vadd.f32 %v1847_v8, %v538_v63  ;;  %660 = vmatpush.msrb.mxu0 %v1739_v12 }
 0x26d   :  { %1055 = vmatpush.msrb.mxu3 %v1576_v9 }
 0x26e   :  { %v542_v23 = vadd.f32 %v541_v58, %v539_v0  ;;  %661 = vmatpush.msrb.mxu0 %v1746_v13 }
 0x26f   :  { %1056 = vmatpush.msrb.mxu3 %v1579_v10 }
 0x270   :  { %v543_v6 = vsub.f32 %v542_v23, %v439_v4  ;;  %662 = vmatpush.msrb.mxu0 %v1751_v15 }
 0x271   :  { %1057 = vmatpush.msrb.mxu3 %v1585_v14  ;;  %v1046_v14 = vmul.f32 0.9, %v942_v22 }
 0x272   :  { %vm544_vm2 = vcmp.gt.f32.partialorder %v543_v6, 1.0  ;;  %663 = vmatpush.msrb.mxu0 %v1756_v62 }
 0x273   :  { %1058 = vmatpush.msrb.mxu3 %v1588_v16  ;;  %1159 = vmatmul.msk.f32.vlgmr.msra.gmra.mxu0 %vm544_vm2, %v1383_v43 }
 0x274   :  { %664 = vmatpush.msrb.mxu0 %v1761_v17 }
 0x275   :  { %1059 = vmatpush.msrb.mxu3 %v1596_v19  ;;  %v944_v19 = vsel %vm943_vm1, 1.0, %v1384_v48 }
 0x276   :  { %665 = vmatpush.msrb.mxu0 %v1766_v29 }
 0x277   :  { %1060 = vmatpush.msrb.mxu3 %v1599_v24 }
 0x278   :  { %666 = vmatpush.msrb.mxu0 %v1771_v34 }
 0x279   :  { %1061 = vmatpush.msrb.mxu3 %v1605_v41 }
 0x27a   :  { %667 = vmatpush.msrb.mxu0 %v1776_v37 }
 0x27b   :  { %1062 = vmatpush.msrb.mxu3 %v1608_v44 }
 0x27c   :  { %758 = vmatpush.msra.mxu0 %v1699_v50 }
 0x27d   :  { %1063 = vmatpush.msrb.mxu3 %v1616_v47  ;;  %v647_v47 = vmul.f32 0.9, %v543_v6 }
 0x27e   :  { %759 = vmatpush.msra.mxu0 %v1704_v56 }
 0x27f   :  { %1064 = vmatpush.msrb.mxu3 %v1619_v49 }
 0x280   :  { %760 = vmatpush.msra.mxu0 %v1709_v1  ;;  %v1043_v9 = vpop.f32.mrf.mxu2 }
 0x281   :  { %v1044_v10 = vadd.f32 %v1660_v59, %v1043_v9  ;;  %1065 = vmatpush.msrb.mxu3 %v1625_v54  ;;  %v545_v54 = vsel %vm544_vm2, 1.0, %v1384_v48 }
 0x282   :  { %761 = vmatpush.msra.mxu0 %v1714_v2 }
 0x283   :  { %v1047_v16 = vadd.f32 %v1046_v14, %v1044_v10  ;;  %1066 = vmatpush.msrb.mxu3 %v1630_v57  ;;  %v460_v14 = vmul.f32 0.9, %v2054_v53 }
 0x284   :  { %762 = vmatpush.msra.mxu0 %v1719_v3 }
 0x285   :  { %v1048_v24 = vsub.f32 %v1047_v16, %v944_v19 }
 0x286   :  { %763 = vmatpush.msra.mxu0 %v1724_v5 }
 0x287   :  { %vm1049_vm3 = vcmp.gt.f32.partialorder %v1048_v24, 1.0  ;;  %v359_v24 = vsel %vm358_vm15, 1.0, %v1384_v48 }
 0x288   :  { %764 = vmatpush.msra.mxu0 %v1729_v7  ;;  %1178 = vmatmul.msk.f32.vlgmr.msrb.gmra.mxu3 %vm1049_vm3, %v1383_v43 }
 0x28a   :  { %765 = vmatpush.msra.mxu0 %v1734_v11 }
 0x28b   :  { %v644_v41 = vpop.f32.mrf.mxu3 }
 0x28c   :  { %766 = vmatpush.msra.mxu0 %v1739_v12  ;;  %v645_v44 = vadd.f32 %v1847_v8, %v644_v41 }
 0x28e   :  { %767 = vmatpush.msra.mxu0 %v1746_v13  ;;  %v648_v49 = vadd.f32 %v647_v47, %v645_v44 }
 0x290   :  { %768 = vmatpush.msra.mxu0 %v1751_v15  ;;  %v649_v57 = vsub.f32 %v648_v49, %v545_v54 }
 0x292   :  { %769 = vmatpush.msra.mxu0 %v1756_v62  ;;  %vm650_vm4 = vcmp.gt.f32.partialorder %v649_v57, 1.0  ;;  %v753_v26 = vmul.f32 0.9, %v649_v57 }
 0x293   :  { %1163 = vmatmul.msk.f32.vlgmr.msrb.gmra.mxu0 %vm650_vm4, %v1383_v43  ;;  %v651_v27 = vsel %vm650_vm4, 1.0, %v1384_v48 }
 0x294   :  { %770 = vmatpush.msra.mxu0 %v1761_v17 }
 0x296   :  { %771 = vmatpush.msra.mxu0 %v1766_v29 }
 0x298   :  { %772 = vmatpush.msra.mxu0 %v1771_v34 }
 0x29a   :  { %773 = vmatpush.msra.mxu0 %v1776_v37 }
 0x29c   :  { %864 = vmatpush.msrb.mxu0 %v1699_v50 }
 0x29e   :  { %865 = vmatpush.msrb.mxu0 %v1704_v56 }
 0x2a0   :  { %866 = vmatpush.msrb.mxu0 %v1709_v1 }
 0x2a2   :  { %867 = vmatpush.msrb.mxu0 %v1714_v2 }
 0x2a4   :  { %868 = vmatpush.msrb.mxu0 %v1719_v3 }
 0x2a6   :  { %869 = vmatpush.msrb.mxu0 %v1724_v5 }
 0x2a8   :  { %870 = vmatpush.msrb.mxu0 %v1729_v7 }
 0x2aa   :  { %871 = vmatpush.msrb.mxu0 %v1734_v11 }
 0x2ab   :  { %v750_v59 = vpop.f32.mrf.mxu3 }
 0x2ac   :  { %872 = vmatpush.msrb.mxu0 %v1739_v12  ;;  %v751_v25 = vadd.f32 %v1847_v8, %v750_v59 }
 0x2ae   :  { %873 = vmatpush.msrb.mxu0 %v1746_v13  ;;  %v754_v45 = vadd.f32 %v753_v26, %v751_v25 }
 0x2b0   :  { %874 = vmatpush.msrb.mxu0 %v1751_v15  ;;  %v755_v40 = vsub.f32 %v754_v45, %v651_v27 }
 0x2b2   :  { %875 = vmatpush.msrb.mxu0 %v1756_v62  ;;  %vm756_vm5 = vcmp.gt.f32.partialorder %v755_v40, 1.0  ;;  %v859_v58 = vmul.f32 0.9, %v755_v40 }
 0x2b3   :  { %1167 = vmatmul.msk.f32.vlgmr.msra.gmra.mxu0 %vm756_vm5, %v1383_v43  ;;  %v757_v6 = vsel %vm756_vm5, 1.0, %v1384_v48 }
 0x2b4   :  { %876 = vmatpush.msrb.mxu0 %v1761_v17 }
 0x2b6   :  { %877 = vmatpush.msrb.mxu0 %v1766_v29 }
 0x2b8   :  { %878 = vmatpush.msrb.mxu0 %v1771_v34 }
 0x2ba   :  { %879 = vmatpush.msrb.mxu0 %v1776_v37 }
 0x2bc   :  { %970 = vmatpush.msra.mxu0 %v1699_v50 }
 0x2be   :  { %971 = vmatpush.msra.mxu0 %v1704_v56 }
 0x2c0   :  { %972 = vmatpush.msra.mxu0 %v1709_v1 }
 0x2c2   :  { %973 = vmatpush.msra.mxu0 %v1714_v2 }
 0x2c4   :  { %974 = vmatpush.msra.mxu0 %v1719_v3 }
 0x2c6   :  { %975 = vmatpush.msra.mxu0 %v1724_v5 }
 0x2c8   :  { %976 = vmatpush.msra.mxu0 %v1729_v7  ;;  %v377_v61 = vpop.f32.mrf.mxu1 }
 0x2c9   :  { %v2202_v22 = vadd.f32 %v2197_v42, %v377_v61 }
 0x2ca   :  { %977 = vmatpush.msra.mxu0 %v1734_v11 }
 0x2cb   :  { %v856_v63 = vpop.f32.mrf.mxu3  ;;  %vm382_vm6 = vcmp.gt.f32.partialorder %v2202_v22, 1.0 }
 0x2cc   :  { %978 = vmatpush.msra.mxu0 %v1739_v12  ;;  %v857_v0 = vadd.f32 %v1847_v8, %v856_v63  ;;  %v2209_v23 = vsel %vm382_vm6, 1.0, %v1384_v48 }
 0x2cd   :  { %384 = vst [vmem:[#allocation13] sm:$0xff] %v2209_v23 }
 0x2ce   :  { %979 = vmatpush.msra.mxu0 %v1746_v13  ;;  %v860_v4 = vadd.f32 %v859_v58, %v857_v0 }
 0x2d0   :  { %980 = vmatpush.msra.mxu0 %v1751_v15  ;;  %v861_v9 = vsub.f32 %v860_v4, %v757_v6 }
 0x2d2   :  { %981 = vmatpush.msra.mxu0 %v1756_v62  ;;  %vm862_vm7 = vcmp.gt.f32.partialorder %v861_v9, 1.0 }
 0x2d3   :  { %1171 = vmatmul.msk.f32.vlgmr.msrb.gmra.mxu0 %vm862_vm7, %v1383_v43 }
 0x2d4   :  { %982 = vmatpush.msra.mxu0 %v1761_v17 }
 0x2d6   :  { %983 = vmatpush.msra.mxu0 %v1766_v29 }
 0x2d8   :  { %v457_v10 = vpop.f32.mrf.mxu0  ;;  %984 = vmatpush.msra.mxu0 %v1771_v34 }
 0x2d9   :  { %v458_v16 = vadd.f32 %v2046_v55, %v457_v10 }
 0x2da   :  { %985 = vmatpush.msra.mxu0 %v1776_v37 }
 0x2db   :  { %v461_v19 = vadd.f32 %v460_v14, %v458_v16  ;;  %v485_v14 = vmul.f32 0.9, %v2202_v22 }
 0x2dc   :  { %1076 = vmatpush.msrb.mxu0 %v1699_v50 }
 0x2dd   :  { %v462_v41 = vsub.f32 %v461_v19, %v359_v24 }
 0x2de   :  { %1077 = vmatpush.msrb.mxu0 %v1704_v56 }
 0x2df   :  { %vm463_vm8 = vcmp.gt.f32.partialorder %v462_v41, 1.0 }
 0x2e0   :  { %1078 = vmatpush.msrb.mxu0 %v1709_v1  ;;  %1156 = vmatmul.msk.f32.vlgmr.msra.gmra.mxu1 %vm463_vm8, %v1383_v43  ;;  %v965_v1 = vmul.f32 0.9, %v861_v9 }
 0x2e1   :  { %677 = vmatpush.msra.mxu1 %v1948_v28 }
 0x2e2   :  { %1079 = vmatpush.msrb.mxu0 %v1714_v2 }
 0x2e3   :  { %678 = vmatpush.msra.mxu1 %v1952_v30 }
 0x2e4   :  { %1080 = vmatpush.msrb.mxu0 %v1719_v3  ;;  %v863_v3 = vsel %vm862_vm7, 1.0, %v1384_v48 }
 0x2e5   :  { %679 = vmatpush.msra.mxu1 %v1956_v31 }
 0x2e6   :  { %1081 = vmatpush.msrb.mxu0 %v1724_v5 }
 0x2e7   :  { %680 = vmatpush.msra.mxu1 %v1960_v32 }
 0x2e8   :  { %1082 = vmatpush.msrb.mxu0 %v1729_v7 }
 0x2e9   :  { %681 = vmatpush.msra.mxu1 %v1964_v33 }
 0x2ea   :  { %1083 = vmatpush.msrb.mxu0 %v1734_v11 }
 0x2eb   :  { %v962_v50 = vpop.f32.mrf.mxu3  ;;  %682 = vmatpush.msra.mxu1 %v1968_v35 }
 0x2ec   :  { %1084 = vmatpush.msrb.mxu0 %v1739_v12  ;;  %v963_v56 = vadd.f32 %v1847_v8, %v962_v50  ;;  %v566_v12 = vmul.f32 0.9, %v462_v41 }
 0x2ed   :  { %683 = vmatpush.msra.mxu1 %v1972_v36 }
 0x2ee   :  { %1085 = vmatpush.msrb.mxu0 %v1746_v13  ;;  %v966_v2 = vadd.f32 %v965_v1, %v963_v56 }
 0x2ef   :  { %684 = vmatpush.msra.mxu1 %v1976_v38 }
 0x2f0   :  { %1086 = vmatpush.msrb.mxu0 %v1751_v15  ;;  %v967_v5 = vsub.f32 %v966_v2, %v863_v3  ;;  %v563_v7 = vpop.f32.mrf.mxu0  ;;  %v464_v15 = vsel %vm463_vm8, 1.0, %v1384_v48 }
 0x2f1   :  { %v564_v11 = vadd.f32 %v2046_v55, %v563_v7  ;;  %685 = vmatpush.msra.mxu1 %v1980_v39 }
 0x2f2   :  { %1087 = vmatpush.msrb.mxu0 %v1756_v62  ;;  %vm968_vm9 = vcmp.gt.f32.partialorder %v967_v5, 1.0 }
 0x2f3   :  { %1175 = vmatmul.msk.f32.vlgmr.msra.gmra.mxu0 %vm968_vm9, %v1383_v43  ;;  %v567_v13 = vadd.f32 %v566_v12, %v564_v11  ;;  %686 = vmatpush.msra.mxu1 %v1988_v60 }
 0x2f4   :  { %1088 = vmatpush.msrb.mxu0 %v1761_v17 }
 0x2f5   :  { %v568_v53 = vsub.f32 %v567_v13, %v464_v15  ;;  %687 = vmatpush.msra.mxu1 %v1994_v18 }
 0x2f6   :  { %1089 = vmatpush.msrb.mxu0 %v1766_v29  ;;  %v1071_v29 = vmul.f32 0.9, %v967_v5 }
 0x2f7   :  { %vm569_vm10 = vcmp.gt.f32.partialorder %v568_v53, 1.0  ;;  %688 = vmatpush.msra.mxu1 %v1996_v51  ;;  %v672_v54 = vmul.f32 0.9, %v568_v53 }
 0x2f8   :  { %1160 = vmatmul.msk.f32.vlgmr.msrb.gmra.mxu1 %vm569_vm10, %v1383_v43  ;;  %1090 = vmatpush.msrb.mxu0 %v1771_v34  ;;  %v570_v57 = vsel %vm569_vm10, 1.0, %v1384_v48 }
 0x2f9   :  { %689 = vmatpush.msra.mxu1 %v2000_v52 }
 0x2fa   :  { %1091 = vmatpush.msrb.mxu0 %v1776_v37  ;;  %v969_v37 = vsel %vm968_vm9, 1.0, %v1384_v48 }
 0x2fb   :  { %690 = vmatpush.msra.mxu1 %v2006_v46 }
 0x2fd   :  { %691 = vmatpush.msra.mxu1 %v2010_v20 }
 0x2ff   :  { %692 = vmatpush.msra.mxu1 %v2014_v21 }
 0x301   :  { %783 = vmatpush.msrb.mxu1 %v1948_v28 }
 0x303   :  { %784 = vmatpush.msrb.mxu1 %v1952_v30 }
 0x305   :  { %785 = vmatpush.msrb.mxu1 %v1956_v31 }
 0x307   :  { %786 = vmatpush.msrb.mxu1 %v1960_v32 }
 0x309   :  { %787 = vmatpush.msrb.mxu1 %v1964_v33 }
 0x30b   :  { %788 = vmatpush.msrb.mxu1 %v1968_v35  ;;  %v1068_v62 = vpop.f32.mrf.mxu3 }
 0x30c   :  { %v1069_v17 = vadd.f32 %v1847_v8, %v1068_v62 }
 0x30d   :  { %789 = vmatpush.msrb.mxu1 %v1972_v36 }
 0x30e   :  { %v1072_v34 = vadd.f32 %v1071_v29, %v1069_v17 }
 0x30f   :  { %790 = vmatpush.msrb.mxu1 %v1976_v38 }
 0x310   :  { %v1073_v44 = vsub.f32 %v1072_v34, %v969_v37  ;;  %v669_v47 = vpop.f32.mrf.mxu0 }
 0x311   :  { %791 = vmatpush.msrb.mxu1 %v1980_v39  ;;  %v670_v49 = vadd.f32 %v2046_v55, %v669_v47 }
 0x312   :  { %vm1074_vm11 = vcmp.gt.f32.partialorder %v1073_v44, 1.0 }
 0x313   :  { %792 = vmatpush.msrb.mxu1 %v1988_v60  ;;  %1179 = vmatmul.msk.f32.vlgmr.msrb.gmra.mxu0 %vm1074_vm11, %v1383_v43  ;;  %v673_v8 = vadd.f32 %v672_v54, %v670_v49 }
 0x315   :  { %793 = vmatpush.msrb.mxu1 %v1994_v18  ;;  %v674_v59 = vsub.f32 %v673_v8, %v570_v57 }
 0x317   :  { %794 = vmatpush.msrb.mxu1 %v1996_v51  ;;  %vm675_vm12 = vcmp.gt.f32.partialorder %v674_v59, 1.0  ;;  %v778_v45 = vmul.f32 0.9, %v674_v59 }
 0x318   :  { %1164 = vmatmul.msk.f32.vlgmr.msra.gmra.mxu1 %vm675_vm12, %v1383_v43  ;;  %v676_v40 = vsel %vm675_vm12, 1.0, %v1384_v48 }
 0x319   :  { %795 = vmatpush.msrb.mxu1 %v2000_v52 }
 0x31b   :  { %796 = vmatpush.msrb.mxu1 %v2006_v46 }
 0x31d   :  { %797 = vmatpush.msrb.mxu1 %v2010_v20 }
 0x31f   :  { %798 = vmatpush.msrb.mxu1 %v2014_v21 }
 0x321   :  { %889 = vmatpush.msra.mxu1 %v1948_v28 }
 0x323   :  { %890 = vmatpush.msra.mxu1 %v1952_v30 }
 0x325   :  { %891 = vmatpush.msra.mxu1 %v1956_v31 }
 0x327   :  { %892 = vmatpush.msra.mxu1 %v1960_v32 }
 0x329   :  { %893 = vmatpush.msra.mxu1 %v1964_v33 }
 0x32b   :  { %894 = vmatpush.msra.mxu1 %v1968_v35 }
 0x32d   :  { %895 = vmatpush.msra.mxu1 %v1972_v36 }
 0x32f   :  { %896 = vmatpush.msra.mxu1 %v1976_v38 }
 0x330   :  { %v775_v25 = vpop.f32.mrf.mxu0 }
 0x331   :  { %897 = vmatpush.msra.mxu1 %v1980_v39  ;;  %v776_v26 = vadd.f32 %v2046_v55, %v775_v25 }
 0x333   :  { %898 = vmatpush.msra.mxu1 %v1988_v60  ;;  %v779_v27 = vadd.f32 %v778_v45, %v776_v26 }
 0x335   :  { %899 = vmatpush.msra.mxu1 %v1994_v18  ;;  %v780_v61 = vsub.f32 %v779_v27, %v676_v40 }
 0x337   :  { %900 = vmatpush.msra.mxu1 %v1996_v51  ;;  %vm781_vm13 = vcmp.gt.f32.partialorder %v780_v61, 1.0  ;;  %v884_v58 = vmul.f32 0.9, %v780_v61 }
 0x338   :  { %1168 = vmatmul.msk.f32.vlgmr.msrb.gmra.mxu1 %vm781_vm13, %v1383_v43  ;;  %v782_v6 = vsel %vm781_vm13, 1.0, %v1384_v48 }
 0x339   :  { %901 = vmatpush.msra.mxu1 %v2000_v52 }
 0x33b   :  { %902 = vmatpush.msra.mxu1 %v2006_v46 }
 0x33d   :  { %903 = vmatpush.msra.mxu1 %v2010_v20 }
 0x33f   :  { %904 = vmatpush.msra.mxu1 %v2014_v21 }
 0x341   :  { %995 = vmatpush.msrb.mxu1 %v1948_v28 }
 0x343   :  { %996 = vmatpush.msrb.mxu1 %v1952_v30 }
 0x345   :  { %997 = vmatpush.msrb.mxu1 %v1956_v31 }
 0x347   :  { %998 = vmatpush.msrb.mxu1 %v1960_v32 }
 0x349   :  { %999 = vmatpush.msrb.mxu1 %v1964_v33 }
 0x34b   :  { %1000 = vmatpush.msrb.mxu1 %v1968_v35 }
 0x34d   :  { %1001 = vmatpush.msrb.mxu1 %v1972_v36 }
 0x34f   :  { %1002 = vmatpush.msrb.mxu1 %v1976_v38 }
 0x350   :  { %v881_v63 = vpop.f32.mrf.mxu0 }
 0x351   :  { %1003 = vmatpush.msrb.mxu1 %v1980_v39  ;;  %v882_v0 = vadd.f32 %v2046_v55, %v881_v63 }
 0x353   :  { %1004 = vmatpush.msrb.mxu1 %v1988_v60  ;;  %v885_v4 = vadd.f32 %v884_v58, %v882_v0 }
 0x355   :  { %1005 = vmatpush.msrb.mxu1 %v1994_v18  ;;  %v886_v9 = vsub.f32 %v885_v4, %v782_v6 }
 0x357   :  { %1006 = vmatpush.msrb.mxu1 %v1996_v51  ;;  %vm887_vm14 = vcmp.gt.f32.partialorder %v886_v9, 1.0  ;;  %v990_v22 = vmul.f32 0.9, %v886_v9 }
 0x358   :  { %1172 = vmatmul.msk.f32.vlgmr.msra.gmra.mxu1 %vm887_vm14, %v1383_v43 }
 0x359   :  { %1007 = vmatpush.msrb.mxu1 %v2000_v52 }
 0x35b   :  { %1008 = vmatpush.msrb.mxu1 %v2006_v46 }
 0x35d   :  { %v482_v10 = vpop.f32.mrf.mxu1  ;;  %1009 = vmatpush.msrb.mxu1 %v2010_v20 }
 0x35e   :  { %v483_v16 = vadd.f32 %v2197_v42, %v482_v10 }
 0x35f   :  { %1010 = vmatpush.msrb.mxu1 %v2014_v21 }
 0x360   :  { %v486_v19 = vadd.f32 %v485_v14, %v483_v16 }
 0x361   :  { %1101 = vmatpush.msra.mxu1 %v1948_v28 }
 0x362   :  { %v487_v24 = vsub.f32 %v486_v19, %v2209_v23 }
 0x363   :  { %1102 = vmatpush.msra.mxu1 %v1952_v30 }
 0x364   :  { %vm488_vm15 = vcmp.gt.f32.partialorder %v487_v24, 1.0  ;;  %v591_v23 = vmul.f32 0.9, %v487_v24 }
 0x365   :  { %1103 = vmatpush.msra.mxu1 %v1956_v31  ;;  %v489_v41 = vsel %vm488_vm15, 1.0, %v1384_v48 }
 0x366   :  { %490 = vst [vmem:[#allocation13 + $0x8] sm:$0xff] %v489_v41 }
 0x367   :  { %1104 = vmatpush.msra.mxu1 %v1960_v32  ;;  %v888_v32 = vsel %vm887_vm14, 1.0, %v1384_v48 }
 0x369   :  { %1105 = vmatpush.msra.mxu1 %v1964_v33 }
 0x36b   :  { %1106 = vmatpush.msra.mxu1 %v1968_v35 }
 0x36d   :  { %1107 = vmatpush.msra.mxu1 %v1972_v36 }
 0x36f   :  { %1108 = vmatpush.msra.mxu1 %v1976_v38 }
 0x370   :  { %v987_v28 = vpop.f32.mrf.mxu0 }
 0x371   :  { %1109 = vmatpush.msra.mxu1 %v1980_v39  ;;  %v988_v30 = vadd.f32 %v2046_v55, %v987_v28 }
 0x373   :  { %1110 = vmatpush.msra.mxu1 %v1988_v60  ;;  %v991_v31 = vadd.f32 %v990_v22, %v988_v30 }
 0x375   :  { %1111 = vmatpush.msra.mxu1 %v1994_v18  ;;  %v992_v33 = vsub.f32 %v991_v31, %v888_v32  ;;  %v588_v35 = vpop.f32.mrf.mxu1 }
 0x376   :  { %v589_v36 = vadd.f32 %v2197_v42, %v588_v35 }
 0x377   :  { %1112 = vmatpush.msra.mxu1 %v1996_v51  ;;  %vm993_vm0 = vcmp.gt.f32.partialorder %v992_v33, 1.0  ;;  %v1096_v50 = vmul.f32 0.9, %v992_v33 }
 0x378   :  { %1176 = vmatmul.msk.f32.vlgmr.msrb.gmra.mxu1 %vm993_vm0, %v1383_v43  ;;  %v592_v38 = vadd.f32 %v591_v23, %v589_v36  ;;  %v994_v1 = vsel %vm993_vm0, 1.0, %v1384_v48 }
 0x379   :  { %1113 = vmatpush.msra.mxu1 %v2000_v52 }
 0x37a   :  { %v593_v39 = vsub.f32 %v592_v38, %v489_v41 }
 0x37b   :  { %1114 = vmatpush.msra.mxu1 %v2006_v46 }
 0x37c   :  { %vm594_vm1 = vcmp.gt.f32.partialorder %v593_v39, 1.0  ;;  %v697_v46 = vmul.f32 0.9, %v593_v39 }
 0x37d   :  { %1115 = vmatpush.msra.mxu1 %v2010_v20  ;;  %v595_v60 = vsel %vm594_vm1, 1.0, %v1384_v48 }
 0x37e   :  { %596 = vst [vmem:[#allocation13 + $0x10] sm:$0xff] %v595_v60 }
 0x37f   :  { %1116 = vmatpush.msra.mxu1 %v2014_v21 }
 0x390   :  { %v1093_v18 = vpop.f32.mrf.mxu0 }
 0x391   :  { %v1094_v51 = vadd.f32 %v2046_v55, %v1093_v18 }
 0x393   :  { %v1097_v56 = vadd.f32 %v1096_v50, %v1094_v51 }
 0x395   :  { %v1098_v2 = vsub.f32 %v1097_v56, %v994_v1  ;;  %v694_v52 = vpop.f32.mrf.mxu1 }
 0x396   :  { %v695_v3 = vadd.f32 %v2197_v42, %v694_v52 }
 0x397   :  { %vm1099_vm2 = vcmp.gt.f32.partialorder %v1098_v2, 1.0 }
 0x398   :  { %1180 = vmatmul.msk.f32.vlgmr.msra.gmra.mxu1 %vm1099_vm2, %v1383_v43  ;;  %v698_v20 = vadd.f32 %v697_v46, %v695_v3 }
 0x39a   :  { %v699_v5 = vsub.f32 %v698_v20, %v595_v60 }
 0x39c   :  { %vm700_vm3 = vcmp.gt.f32.partialorder %v699_v5, 1.0  ;;  %v803_v11 = vmul.f32 0.9, %v699_v5 }
 0x39d   :  { %v701_v21 = vsel %vm700_vm3, 1.0, %v1384_v48 }
 0x39e   :  { %702 = vst [vmem:[#allocation13 + $0x18] sm:$0xff] %v701_v21 }
 0x3b5   :  { %v800_v7 = vpop.f32.mrf.mxu1 }
 0x3b6   :  { %v801_v55 = vadd.f32 %v2197_v42, %v800_v7 }
 0x3b8   :  { %v804_v12 = vadd.f32 %v803_v11, %v801_v55 }
 0x3ba   :  { %v805_v13 = vsub.f32 %v804_v12, %v701_v21 }
 0x3bc   :  { %vm806_vm4 = vcmp.gt.f32.partialorder %v805_v13, 1.0  ;;  %v909_v43 = vmul.f32 0.9, %v805_v13 }
 0x3bd   :  { %v807_v15 = vsel %vm806_vm4, 1.0, %v1384_v48 }
 0x3be   :  { %808 = vst [vmem:[#allocation13 + $0x20] sm:$0xff] %v807_v15 }
 0x3d5   :  { %v906_v53 = vpop.f32.mrf.mxu1 }
 0x3d6   :  { %v907_v62 = vadd.f32 %v2197_v42, %v906_v53 }
 0x3d8   :  { %v910_v17 = vadd.f32 %v909_v43, %v907_v62 }
 0x3da   :  { %v911_v29 = vsub.f32 %v910_v17, %v807_v15 }
 0x3dc   :  { %vm912_vm5 = vcmp.gt.f32.partialorder %v911_v29, 1.0  ;;  %v1015_v47 = vmul.f32 0.9, %v911_v29 }
 0x3dd   :  { %v913_v34 = vsel %vm912_vm5, 1.0, %v1384_v48 }
 0x3de   :  { %914 = vst [vmem:[#allocation13 + $0x28] sm:$0xff] %v913_v34 }
 0x3f5   :  { %v1012_v37 = vpop.f32.mrf.mxu1 }
 0x3f6   :  { %v1013_v44 = vadd.f32 %v2197_v42, %v1012_v37 }
 0x3f8   :  { %v1016_v49 = vadd.f32 %v1015_v47, %v1013_v44 }
 0x3fa   :  { %v1017_v54 = vsub.f32 %v1016_v49, %v913_v34 }
 0x3fc   :  { %vm1018_vm6 = vcmp.gt.f32.partialorder %v1017_v54, 1.0  ;;  %v1121_v25 = vmul.f32 0.9, %v1017_v54 }
 0x3fd   :  { %v1019_v8 = vsel %vm1018_vm6, 1.0, %v1384_v48 }
 0x3fe   :  { %1020 = vst [vmem:[#allocation13 + $0x30] sm:$0xff] %v1019_v8 }
 0x415   :  { %v1118_v57 = vpop.f32.mrf.mxu1 }
 0x416   :  { %v1119_v59 = vadd.f32 %v2197_v42, %v1118_v57 }
 0x418   :  { %v1122_v26 = vadd.f32 %v1121_v25, %v1119_v59 }
 0x41a   :  { %v1123_v45 = vsub.f32 %v1122_v26, %v1019_v8 }
 0x41c   :  { %vm1124_vm7 = vcmp.gt.f32.partialorder %v1123_v45, 1.0 }
 0x41d   :  { %v1125_v27 = vsel %vm1124_vm7, 1.0, %v1384_v48 }
 0x41e   :  { %1126 = vst [vmem:[#allocation13 + $0x38] sm:$0xff] %v1125_v27 }
 0x41f   :  { %1139 = dma.vmem_to_hbm [thread:$0]  %s1132_s5, 1024, %s1134_s14, [#allocation4], %s1376_s25, %s1376_s25, %s1377_s26  }
 0x420   :  { %1373 = dma.done.wait [#allocation4], 1024  }
 0x421   :  { %1374 = vsyncadd [#allocation4], 4294966272 }
 0x422   :  { %1144 = vsyncpa [#allocation3], 1 }
 0x423   :  { %1145 = vsyncpa [#allocation6], 1 }
 0x424   :  { %1146 = vsyncpa [#allocation9], 1 }
 0x425   :  { %1147 = vsyncpa [#allocation12], 1 }
 0x426   :  { %1148 = vsyncpa [#allocation4], 1 }

</bundles_post_ra>
